<compile_context>
chip_gen: v7x
topology: tpu7x:2x2x1
jax: 0.10.0
libtpu: 0.0.40
codegen_flags: <defaults>
</compile_context>

<pallas_src>
import functools

import jax
import jax.numpy as jnp
from jax.experimental import pallas as pl
from jax.experimental.pallas import tpu as pltpu


DEFAULT_ROWS_PER_STEP = 64            # tokens gathered per grid step
DMA_RING_DEPTH = 8                    # outstanding row DMAs (HBM-gather path)
RESIDENT_TABLE_MAX_BYTES = 40 << 20   # VMEM-resident fast-path threshold (v7x-safe)


def _min_sublane_rows(dtype) -> int:
    # Packed sublane tile height: 8 rows (32-bit), 16 (16-bit), 32 (8-bit).
    return max(8, 32 // jnp.dtype(dtype).itemsize)


def _resident_gather_kernel(ids_ref, table_ref, o_ref, *, rows_per_step):
    """Table lives in VMEM (grid-invariant block); gather rows into o_ref."""
    base = pl.program_id(0) * rows_per_step
    for j in range(rows_per_step):                    # static unroll
        idx = ids_ref[base + j]                       # SMEM scalar read
        o_ref[pl.ds(j, 1), :] = table_ref[pl.ds(idx, 1), :]


def _hbm_gather_kernel(ids_ref, table_hbm, o_ref, sems, *, rows_per_step):
    """Table stays in HBM; DMA each row straight into the (G, D) output tile."""
    base = pl.program_id(0) * rows_per_step
    inflight = [None] * DMA_RING_DEPTH
    for j in range(rows_per_step):                    # static unroll
        slot = j % DMA_RING_DEPTH
        if inflight[slot] is not None:                # recycle the ring slot
            inflight[slot].wait()
        idx = ids_ref[base + j]
        cp = pltpu.make_async_copy(
            table_hbm.at[pl.ds(idx, 1)],              # (1, D) HBM row window
            o_ref.at[pl.ds(j, 1)],                    # (1, D) slot in output tile
            sems.at[slot],
        )
        cp.start()
        inflight[slot] = cp
    for cp in inflight:
        if cp is not None:
            cp.wait()


def token_embedding(ids, table, *, max_len: int = 5000,
                    rows_per_step: int = DEFAULT_ROWS_PER_STEP,
                    force_hbm_gather: bool = False):
    """ids: (B, S) integer token ids.  table: (V, D) embedding weights.

    Returns table[ids[:, :max_len]] with shape (B, min(S, max_len), D),
    matching TokenEmbedding.forward.
    """
    ids = ids[:, :max_len]                      # PyTorch: input[:, :self.max_len]
    B, S = ids.shape
    V, D = table.shape
    itemsize = jnp.dtype(table.dtype).itemsize

    # Lane-align d_model so every output store is an unmasked, lane-dense vst.
    D_pad = ((D + 127) // 128) * 128
    if D_pad != D:
        table = jnp.pad(table, ((0, 0), (0, D_pad - D)))

    # Rows per step must be a multiple of the dtype's packed sublane count.
    m = _min_sublane_rows(table.dtype)
    G = max(m, (rows_per_step // m) * m)

    N = B * S
    n_blocks = pl.cdiv(N, G)
    N_pad = n_blocks * G

    # nn.Embedding would raise on out-of-range ids; clamping keeps every access
    # in-bounds on hardware (documented deviation).  Padded tail ids gather
    # row 0 and are sliced off below.
    flat_ids = jnp.clip(ids.reshape(-1).astype(jnp.int32), 0, V - 1)
    flat_ids = jnp.pad(flat_ids, (0, N_pad - N))
    # TODO(synk): chunk flat_ids over token blocks once B*min(S, max_len) nears
    # ~256K tokens (the whole array is copied to SMEM by scalar prefetch).

    out_shape = jax.ShapeDtypeStruct((N_pad, D_pad), table.dtype)
    out_spec = pl.BlockSpec((G, D_pad), lambda i, ids_ref: (i, 0))
    table_bytes = V * D_pad * itemsize
    out_bytes = N_pad * D_pad * itemsize

    use_resident = (not force_hbm_gather) and table_bytes <= RESIDENT_TABLE_MAX_BYTES

    if use_resident:
        # Fast path: table streamed into VMEM once, gathered in-kernel.
        kernel = functools.partial(_resident_gather_kernel, rows_per_step=G)
        grid_spec = pltpu.PrefetchScalarGridSpec(
            num_scalar_prefetch=1,
            grid=(n_blocks,),
            in_specs=[pl.BlockSpec((V, D_pad), lambda i, ids_ref: (0, 0))],
            out_specs=out_spec,
        )
        vmem_limit = int(max(32 << 20,
                             table_bytes + 4 * G * D_pad * itemsize + (4 << 20)))
        compiler_params = pltpu.CompilerParams(
            dimension_semantics=("parallel",),     # v7x: 2 TCs split token blocks
            vmem_limit_bytes=vmem_limit,
        )
        cost = pl.CostEstimate(flops=0, transcendentals=0,
                               bytes_accessed=int(table_bytes + out_bytes))
        out_flat = pl.pallas_call(
            kernel, out_shape=out_shape, grid_spec=grid_spec,
            compiler_params=compiler_params, cost_estimate=cost,
        )(flat_ids, table)
    else:
        # Large-vocab path: table stays in HBM, manual DMA gather per row.
        kernel = functools.partial(_hbm_gather_kernel, rows_per_step=G)
        grid_spec = pltpu.PrefetchScalarGridSpec(
            num_scalar_prefetch=1,
            grid=(n_blocks,),
            in_specs=[pl.BlockSpec(memory_space=pl.ANY)],
            out_specs=out_spec,
            scratch_shapes=[pltpu.SemaphoreType.DMA((DMA_RING_DEPTH,))],
        )
        compiler_params = pltpu.CompilerParams(
            dimension_semantics=("parallel",),
        )
        cost = pl.CostEstimate(flops=0, transcendentals=0,
                               bytes_accessed=int(2 * out_bytes))
        out_flat = pl.pallas_call(
            kernel, out_shape=out_shape, grid_spec=grid_spec,
            compiler_params=compiler_params, cost_estimate=cost,
        )(flat_ids, table)

    out = out_flat[:N].reshape(B, S, D_pad)
    if D_pad != D:
        out = out[..., :D]
    return out


if __name__ == "__main__":
    B, S, D = 4, 40, 128        # d_model multiple of 128 -> lane-dense tiles
    VOCAB = 64

    key = jax.random.PRNGKey(0)
    k_ids, k_tab = jax.random.split(key)
    ids = jax.random.randint(k_ids, (B, S), 0, VOCAB, dtype=jnp.int32)
    table = jax.random.normal(k_tab, (VOCAB, D), dtype=jnp.float32)

    ref = jnp.take(table, ids, axis=0)

    # Resident-table fast path (small vocab -> table lives in VMEM).
    out = jax.block_until_ready(token_embedding(ids, table))
    assert out.shape == (B, S, D)
    assert jnp.array_equal(out, ref), "resident-table lookup mismatch"

    # HBM manual-DMA gather path (what large vocabularies take).
    out_hbm = jax.block_until_ready(token_embedding(ids, table, force_hbm_gather=True))
    assert out_hbm.shape == (B, S, D)
    assert jnp.array_equal(out_hbm, ref), "HBM-gather lookup mismatch"

    # max_len truncation path (forward slices input[:, :max_len]).
    out_trunc = jax.block_until_ready(token_embedding(ids, table, max_len=16))
    assert out_trunc.shape == (B, 16, D)
    assert jnp.array_equal(out_trunc, ref[:, :16, :]), "truncated lookup mismatch"

    print("KERNEL_OK")
</pallas_src>

<mosaic_0001>
module attributes {stable_mosaic.version = 11 : i64} {
  func.func @_resident_gather_kernel(%arg0: i32, %arg1: memref<192xi32, #tpu.memory_space<smem>>, %arg2: memref<64x128xf32, #tpu.memory_space<vmem>>, %arg3: memref<64x128xf32, #tpu.memory_space<vmem>>) attributes {dimension_semantics = [#tpu.dimension_semantics<parallel>], iteration_bounds = array<i64: 3>, scalar_prefetch = 1 : i64, scratch_operands = 0 : i64, tpu.core_type = #tpu.core_type<tc>, window_params = [{pipeline_mode = #tpu.pipeline_mode<synchronous>, transform_indices = @transform_0, window_bounds = array<i64: 64, 128>}, {transform_indices = @transform_1, window_bounds = array<i64: 64, 128>}]} {
    %c64_i32 = arith.constant 64 : i32
    %0 = arith.muli %arg0, %c64_i32 : i32
    %c0_i32 = arith.constant 0 : i32
    %1 = arith.addi %0, %c0_i32 : i32
    %2 = arith.index_cast %1 : i32 to index
    %3 = memref.load %arg1[%2] : memref<192xi32, #tpu.memory_space<smem>>
    %4 = arith.index_cast %3 : i32 to index
    %c0 = arith.constant 0 : index
    %5 = vector.load %arg2[%4, %c0] : memref<64x128xf32, #tpu.memory_space<vmem>>, vector<1x128xf32>
    %c0_0 = arith.constant 0 : index
    %c0_1 = arith.constant 0 : index
    %6 = vector.load %arg3[%c0_0, %c0_1] : memref<64x128xf32, #tpu.memory_space<vmem>>, vector<1x128xf32>
    tpu.vector_store %arg3[%c0_0, %c0_1], %5 {strides = array<i32>} : memref<64x128xf32, #tpu.memory_space<vmem>>, vector<1x128xf32>,
    %c1_i32 = arith.constant 1 : i32
    %7 = arith.addi %0, %c1_i32 : i32
    %8 = arith.index_cast %7 : i32 to index
    %9 = memref.load %arg1[%8] : memref<192xi32, #tpu.memory_space<smem>>
    %10 = arith.index_cast %9 : i32 to index
    %c0_2 = arith.constant 0 : index
    %11 = vector.load %arg2[%10, %c0_2] : memref<64x128xf32, #tpu.memory_space<vmem>>, vector<1x128xf32>
    %c1 = arith.constant 1 : index
    %c0_3 = arith.constant 0 : index
    %12 = vector.load %arg3[%c1, %c0_3] : memref<64x128xf32, #tpu.memory_space<vmem>>, vector<1x128xf32>
    tpu.vector_store %arg3[%c1, %c0_3], %11 {strides = array<i32>} : memref<64x128xf32, #tpu.memory_space<vmem>>, vector<1x128xf32>,
    %c2_i32 = arith.constant 2 : i32
    %13 = arith.addi %0, %c2_i32 : i32
    %14 = arith.index_cast %13 : i32 to index
    %15 = memref.load %arg1[%14] : memref<192xi32, #tpu.memory_space<smem>>
    %16 = arith.index_cast %15 : i32 to index
    %c0_4 = arith.constant 0 : index
    %17 = vector.load %arg2[%16, %c0_4] : memref<64x128xf32, #tpu.memory_space<vmem>>, vector<1x128xf32>
    %c2 = arith.constant 2 : index
    %c0_5 = arith.constant 0 : index
    %18 = vector.load %arg3[%c2, %c0_5] : memref<64x128xf32, #tpu.memory_space<vmem>>, vector<1x128xf32>
    tpu.vector_store %arg3[%c2, %c0_5], %17 {strides = array<i32>} : memref<64x128xf32, #tpu.memory_space<vmem>>, vector<1x128xf32>,
    %c3_i32 = arith.constant 3 : i32
    %19 = arith.addi %0, %c3_i32 : i32
    %20 = arith.index_cast %19 : i32 to index
    %21 = memref.load %arg1[%20] : memref<192xi32, #tpu.memory_space<smem>>
    %22 = arith.index_cast %21 : i32 to index
    %c0_6 = arith.constant 0 : index
    %23 = vector.load %arg2[%22, %c0_6] : memref<64x128xf32, #tpu.memory_space<vmem>>, vector<1x128xf32>
    %c3 = arith.constant 3 : index
    %c0_7 = arith.constant 0 : index
    %24 = vector.load %arg3[%c3, %c0_7] : memref<64x128xf32, #tpu.memory_space<vmem>>, vector<1x128xf32>
    tpu.vector_store %arg3[%c3, %c0_7], %23 {strides = array<i32>} : memref<64x128xf32, #tpu.memory_space<vmem>>, vector<1x128xf32>,
    %c4_i32 = arith.constant 4 : i32
    %25 = arith.addi %0, %c4_i32 : i32
    %26 = arith.index_cast %25 : i32 to index
    %27 = memref.load %arg1[%26] : memref<192xi32, #tpu.memory_space<smem>>
    %28 = arith.index_cast %27 : i32 to index
    %c0_8 = arith.constant 0 : index
    %29 = vector.load %arg2[%28, %c0_8] : memref<64x128xf32, #tpu.memory_space<vmem>>, vector<1x128xf32>
    %c4 = arith.constant 4 : index
    %c0_9 = arith.constant 0 : index
    %30 = vector.load %arg3[%c4, %c0_9] : memref<64x128xf32, #tpu.memory_space<vmem>>, vector<1x128xf32>
    tpu.vector_store %arg3[%c4, %c0_9], %29 {strides = array<i32>} : memref<64x128xf32, #tpu.memory_space<vmem>>, vector<1x128xf32>,
    %c5_i32 = arith.constant 5 : i32
    %31 = arith.addi %0, %c5_i32 : i32
    %32 = arith.index_cast %31 : i32 to index
    %33 = memref.load %arg1[%32] : memref<192xi32, #tpu.memory_space<smem>>
    %34 = arith.index_cast %33 : i32 to index
    %c0_10 = arith.constant 0 : index
    %35 = vector.load %arg2[%34, %c0_10] : memref<64x128xf32, #tpu.memory_space<vmem>>, vector<1x128xf32>
    %c5 = arith.constant 5 : index
    %c0_11 = arith.constant 0 : index
    %36 = vector.load %arg3[%c5, %c0_11] : memref<64x128xf32, #tpu.memory_space<vmem>>, vector<1x128xf32>
    tpu.vector_store %arg3[%c5, %c0_11], %35 {strides = array<i32>} : memref<64x128xf32, #tpu.memory_space<vmem>>, vector<1x128xf32>,
    %c6_i32 = arith.constant 6 : i32
    %37 = arith.addi %0, %c6_i32 : i32
    %38 = arith.index_cast %37 : i32 to index
    %39 = memref.load %arg1[%38] : memref<192xi32, #tpu.memory_space<smem>>
    %40 = arith.index_cast %39 : i32 to index
    %c0_12 = arith.constant 0 : index
    %41 = vector.load %arg2[%40, %c0_12] : memref<64x128xf32, #tpu.memory_space<vmem>>, vector<1x128xf32>
    %c6 = arith.constant 6 : index
    %c0_13 = arith.constant 0 : index
    %42 = vector.load %arg3[%c6, %c0_13] : memref<64x128xf32, #tpu.memory_space<vmem>>, vector<1x128xf32>
    tpu.vector_store %arg3[%c6, %c0_13], %41 {strides = array<i32>} : memref<64x128xf32, #tpu.memory_space<vmem>>, vector<1x128xf32>,
    %c7_i32 = arith.constant 7 : i32
    %43 = arith.addi %0, %c7_i32 : i32
    %44 = arith.index_cast %43 : i32 to index
    %45 = memref.load %arg1[%44] : memref<192xi32, #tpu.memory_space<smem>>
    %46 = arith.index_cast %45 : i32 to index
    %c0_14 = arith.constant 0 : index
    %47 = vector.load %arg2[%46, %c0_14] : memref<64x128xf32, #tpu.memory_space<vmem>>, vector<1x128xf32>
    %c7 = arith.constant 7 : index
    %c0_15 = arith.constant 0 : index
    %48 = vector.load %arg3[%c7, %c0_15] : memref<64x128xf32, #tpu.memory_space<vmem>>, vector<1x128xf32>
    tpu.vector_store %arg3[%c7, %c0_15], %47 {strides = array<i32>} : memref<64x128xf32, #tpu.memory_space<vmem>>, vector<1x128xf32>,
    %c8_i32 = arith.constant 8 : i32
    %49 = arith.addi %0, %c8_i32 : i32
    %50 = arith.index_cast %49 : i32 to index
    %51 = memref.load %arg1[%50] : memref<192xi32, #tpu.memory_space<smem>>
    %52 = arith.index_cast %51 : i32 to index
    %c0_16 = arith.constant 0 : index
    %53 = vector.load %arg2[%52, %c0_16] : memref<64x128xf32, #tpu.memory_space<vmem>>, vector<1x128xf32>
    %c8 = arith.constant 8 : index
    %c0_17 = arith.constant 0 : index
    %54 = vector.load %arg3[%c8, %c0_17] : memref<64x128xf32, #tpu.memory_space<vmem>>, vector<1x128xf32>
    tpu.vector_store %arg3[%c8, %c0_17], %53 {strides = array<i32>} : memref<64x128xf32, #tpu.memory_space<vmem>>, vector<1x128xf32>,
    %c9_i32 = arith.constant 9 : i32
    %55 = arith.addi %0, %c9_i32 : i32
    %56 = arith.index_cast %55 : i32 to index
    %57 = memref.load %arg1[%56] : memref<192xi32, #tpu.memory_space<smem>>
    %58 = arith.index_cast %57 : i32 to index
    %c0_18 = arith.constant 0 : index
    %59 = vector.load %arg2[%58, %c0_18] : memref<64x128xf32, #tpu.memory_space<vmem>>, vector<1x128xf32>
    %c9 = arith.constant 9 : index
    %c0_19 = arith.constant 0 : index
    %60 = vector.load %arg3[%c9, %c0_19] : memref<64x128xf32, #tpu.memory_space<vmem>>, vector<1x128xf32>
    tpu.vector_store %arg3[%c9, %c0_19], %59 {strides = array<i32>} : memref<64x128xf32, #tpu.memory_space<vmem>>, vector<1x128xf32>,
    %c10_i32 = arith.constant 10 : i32
    %61 = arith.addi %0, %c10_i32 : i32
    %62 = arith.index_cast %61 : i32 to index
    %63 = memref.load %arg1[%62] : memref<192xi32, #tpu.memory_space<smem>>
    %64 = arith.index_cast %63 : i32 to index
    %c0_20 = arith.constant 0 : index
    %65 = vector.load %arg2[%64, %c0_20] : memref<64x128xf32, #tpu.memory_space<vmem>>, vector<1x128xf32>
    %c10 = arith.constant 10 : index
    %c0_21 = arith.constant 0 : index
    %66 = vector.load %arg3[%c10, %c0_21] : memref<64x128xf32, #tpu.memory_space<vmem>>, vector<1x128xf32>
    tpu.vector_store %arg3[%c10, %c0_21], %65 {strides = array<i32>} : memref<64x128xf32, #tpu.memory_space<vmem>>, vector<1x128xf32>,
    %c11_i32 = arith.constant 11 : i32
    %67 = arith.addi %0, %c11_i32 : i32
    %68 = arith.index_cast %67 : i32 to index
    %69 = memref.load %arg1[%68] : memref<192xi32, #tpu.memory_space<smem>>
    %70 = arith.index_cast %69 : i32 to index
    %c0_22 = arith.constant 0 : index
    %71 = vector.load %arg2[%70, %c0_22] : memref<64x128xf32, #tpu.memory_space<vmem>>, vector<1x128xf32>
    %c11 = arith.constant 11 : index
    %c0_23 = arith.constant 0 : index
    %72 = vector.load %arg3[%c11, %c0_23] : memref<64x128xf32, #tpu.memory_space<vmem>>, vector<1x128xf32>
    tpu.vector_store %arg3[%c11, %c0_23], %71 {strides = array<i32>} : memref<64x128xf32, #tpu.memory_space<vmem>>, vector<1x128xf32>,
    %c12_i32 = arith.constant 12 : i32
    %73 = arith.addi %0, %c12_i32 : i32
    %74 = arith.index_cast %73 : i32 to index
    %75 = memref.load %arg1[%74] : memref<192xi32, #tpu.memory_space<smem>>
    %76 = arith.index_cast %75 : i32 to index
    %c0_24 = arith.constant 0 : index
    %77 = vector.load %arg2[%76, %c0_24] : memref<64x128xf32, #tpu.memory_space<vmem>>, vector<1x128xf32>
    %c12 = arith.constant 12 : index
    %c0_25 = arith.constant 0 : index
    %78 = vector.load %arg3[%c12, %c0_25] : memref<64x128xf32, #tpu.memory_space<vmem>>, vector<1x128xf32>
    tpu.vector_store %arg3[%c12, %c0_25], %77 {strides = array<i32>} : memref<64x128xf32, #tpu.memory_space<vmem>>, vector<1x128xf32>,
    %c13_i32 = arith.constant 13 : i32
    %79 = arith.addi %0, %c13_i32 : i32
    %80 = arith.index_cast %79 : i32 to index
    %81 = memref.load %arg1[%80] : memref<192xi32, #tpu.memory_space<smem>>
    %82 = arith.index_cast %81 : i32 to index
    %c0_26 = arith.constant 0 : index
    %83 = vector.load %arg2[%82, %c0_26] : memref<64x128xf32, #tpu.memory_space<vmem>>, vector<1x128xf32>
    %c13 = arith.constant 13 : index
    %c0_27 = arith.constant 0 : index
    %84 = vector.load %arg3[%c13, %c0_27] : memref<64x128xf32, #tpu.memory_space<vmem>>, vector<1x128xf32>
    tpu.vector_store %arg3[%c13, %c0_27], %83 {strides = array<i32>} : memref<64x128xf32, #tpu.memory_space<vmem>>, vector<1x128xf32>,
    %c14_i32 = arith.constant 14 : i32
    %85 = arith.addi %0, %c14_i32 : i32
    %86 = arith.index_cast %85 : i32 to index
    %87 = memref.load %arg1[%86] : memref<192xi32, #tpu.memory_space<smem>>
    %88 = arith.index_cast %87 : i32 to index
    %c0_28 = arith.constant 0 : index
    %89 = vector.load %arg2[%88, %c0_28] : memref<64x128xf32, #tpu.memory_space<vmem>>, vector<1x128xf32>
    %c14 = arith.constant 14 : index
    %c0_29 = arith.constant 0 : index
    %90 = vector.load %arg3[%c14, %c0_29] : memref<64x128xf32, #tpu.memory_space<vmem>>, vector<1x128xf32>
    tpu.vector_store %arg3[%c14, %c0_29], %89 {strides = array<i32>} : memref<64x128xf32, #tpu.memory_space<vmem>>, vector<1x128xf32>,
    %c15_i32 = arith.constant 15 : i32
    %91 = arith.addi %0, %c15_i32 : i32
    %92 = arith.index_cast %91 : i32 to index
    %93 = memref.load %arg1[%92] : memref<192xi32, #tpu.memory_space<smem>>
    %94 = arith.index_cast %93 : i32 to index
    %c0_30 = arith.constant 0 : index
    %95 = vector.load %arg2[%94, %c0_30] : memref<64x128xf32, #tpu.memory_space<vmem>>, vector<1x128xf32>
    %c15 = arith.constant 15 : index
    %c0_31 = arith.constant 0 : index
    %96 = vector.load %arg3[%c15, %c0_31] : memref<64x128xf32, #tpu.memory_space<vmem>>, vector<1x128xf32>
    tpu.vector_store %arg3[%c15, %c0_31], %95 {strides = array<i32>} : memref<64x128xf32, #tpu.memory_space<vmem>>, vector<1x128xf32>,
    %c16_i32 = arith.constant 16 : i32
    %97 = arith.addi %0, %c16_i32 : i32
    %98 = arith.index_cast %97 : i32 to index
    %99 = memref.load %arg1[%98] : memref<192xi32, #tpu.memory_space<smem>>
    %100 = arith.index_cast %99 : i32 to index
    %c0_32 = arith.constant 0 : index
    %101 = vector.load %arg2[%100, %c0_32] : memref<64x128xf32, #tpu.memory_space<vmem>>, vector<1x128xf32>
    %c16 = arith.constant 16 : index
    %c0_33 = arith.constant 0 : index
    %102 = vector.load %arg3[%c16, %c0_33] : memref<64x128xf32, #tpu.memory_space<vmem>>, vector<1x128xf32>
    tpu.vector_store %arg3[%c16, %c0_33], %101 {strides = array<i32>} : memref<64x128xf32, #tpu.memory_space<vmem>>, vector<1x128xf32>,
    %c17_i32 = arith.constant 17 : i32
    %103 = arith.addi %0, %c17_i32 : i32
    %104 = arith.index_cast %103 : i32 to index
    %105 = memref.load %arg1[%104] : memref<192xi32, #tpu.memory_space<smem>>
    %106 = arith.index_cast %105 : i32 to index
    %c0_34 = arith.constant 0 : index
    %107 = vector.load %arg2[%106, %c0_34] : memref<64x128xf32, #tpu.memory_space<vmem>>, vector<1x128xf32>
    %c17 = arith.constant 17 : index
    %c0_35 = arith.constant 0 : index
    %108 = vector.load %arg3[%c17, %c0_35] : memref<64x128xf32, #tpu.memory_space<vmem>>, vector<1x128xf32>
    tpu.vector_store %arg3[%c17, %c0_35], %107 {strides = array<i32>} : memref<64x128xf32, #tpu.memory_space<vmem>>, vector<1x128xf32>,
    %c18_i32 = arith.constant 18 : i32
    %109 = arith.addi %0, %c18_i32 : i32
    %110 = arith.index_cast %109 : i32 to index
    %111 = memref.load %arg1[%110] : memref<192xi32, #tpu.memory_space<smem>>
    %112 = arith.index_cast %111 : i32 to index
    %c0_36 = arith.constant 0 : index
    %113 = vector.load %arg2[%112, %c0_36] : memref<64x128xf32, #tpu.memory_space<vmem>>, vector<1x128xf32>
    %c18 = arith.constant 18 : index
    %c0_37 = arith.constant 0 : index
    %114 = vector.load %arg3[%c18, %c0_37] : memref<64x128xf32, #tpu.memory_space<vmem>>, vector<1x128xf32>
    tpu.vector_store %arg3[%c18, %c0_37], %113 {strides = array<i32>} : memref<64x128xf32, #tpu.memory_space<vmem>>, vector<1x128xf32>,
    %c19_i32 = arith.constant 19 : i32
    %115 = arith.addi %0, %c19_i32 : i32
    %116 = arith.index_cast %115 : i32 to index
    %117 = memref.load %arg1[%116] : memref<192xi32, #tpu.memory_space<smem>>
    %118 = arith.index_cast %117 : i32 to index
    %c0_38 = arith.constant 0 : index
    %119 = vector.load %arg2[%118, %c0_38] : memref<64x128xf32, #tpu.memory_space<vmem>>, vector<1x128xf32>
    %c19 = arith.constant 19 : index
    %c0_39 = arith.constant 0 : index
    %120 = vector.load %arg3[%c19, %c0_39] : memref<64x128xf32, #tpu.memory_space<vmem>>, vector<1x128xf32>
    tpu.vector_store %arg3[%c19, %c0_39], %119 {strides = array<i32>} : memref<64x128xf32, #tpu.memory_space<vmem>>, vector<1x128xf32>,
    %c20_i32 = arith.constant 20 : i32
    %121 = arith.addi %0, %c20_i32 : i32
    %122 = arith.index_cast %121 : i32 to index
    %123 = memref.load %arg1[%122] : memref<192xi32, #tpu.memory_space<smem>>
    %124 = arith.index_cast %123 : i32 to index
    %c0_40 = arith.constant 0 : index
    %125 = vector.load %arg2[%124, %c0_40] : memref<64x128xf32, #tpu.memory_space<vmem>>, vector<1x128xf32>
    %c20 = arith.constant 20 : index
    %c0_41 = arith.constant 0 : index
    %126 = vector.load %arg3[%c20, %c0_41] : memref<64x128xf32, #tpu.memory_space<vmem>>, vector<1x128xf32>
    tpu.vector_store %arg3[%c20, %c0_41], %125 {strides = array<i32>} : memref<64x128xf32, #tpu.memory_space<vmem>>, vector<1x128xf32>,
    %c21_i32 = arith.constant 21 : i32
    %127 = arith.addi %0, %c21_i32 : i32
    %128 = arith.index_cast %127 : i32 to index
    %129 = memref.load %arg1[%128] : memref<192xi32, #tpu.memory_space<smem>>
    %130 = arith.index_cast %129 : i32 to index
    %c0_42 = arith.constant 0 : index
    %131 = vector.load %arg2[%130, %c0_42] : memref<64x128xf32, #tpu.memory_space<vmem>>, vector<1x128xf32>
    %c21 = arith.constant 21 : index
    %c0_43 = arith.constant 0 : index
    %132 = vector.load %arg3[%c21, %c0_43] : memref<64x128xf32, #tpu.memory_space<vmem>>, vector<1x128xf32>
    tpu.vector_store %arg3[%c21, %c0_43], %131 {strides = array<i32>} : memref<64x128xf32, #tpu.memory_space<vmem>>, vector<1x128xf32>,
    %c22_i32 = arith.constant 22 : i32
    %133 = arith.addi %0, %c22_i32 : i32
    %134 = arith.index_cast %133 : i32 to index
    %135 = memref.load %arg1[%134] : memref<192xi32, #tpu.memory_space<smem>>
    %136 = arith.index_cast %135 : i32 to index
    %c0_44 = arith.constant 0 : index
    %137 = vector.load %arg2[%136, %c0_44] : memref<64x128xf32, #tpu.memory_space<vmem>>, vector<1x128xf32>
    %c22 = arith.constant 22 : index
    %c0_45 = arith.constant 0 : index
    %138 = vector.load %arg3[%c22, %c0_45] : memref<64x128xf32, #tpu.memory_space<vmem>>, vector<1x128xf32>
    tpu.vector_store %arg3[%c22, %c0_45], %137 {strides = array<i32>} : memref<64x128xf32, #tpu.memory_space<vmem>>, vector<1x128xf32>,
    %c23_i32 = arith.constant 23 : i32
    %139 = arith.addi %0, %c23_i32 : i32
    %140 = arith.index_cast %139 : i32 to index
    %141 = memref.load %arg1[%140] : memref<192xi32, #tpu.memory_space<smem>>
    %142 = arith.index_cast %141 : i32 to index
    %c0_46 = arith.constant 0 : index
    %143 = vector.load %arg2[%142, %c0_46] : memref<64x128xf32, #tpu.memory_space<vmem>>, vector<1x128xf32>
    %c23 = arith.constant 23 : index
    %c0_47 = arith.constant 0 : index
    %144 = vector.load %arg3[%c23, %c0_47] : memref<64x128xf32, #tpu.memory_space<vmem>>, vector<1x128xf32>
    tpu.vector_store %arg3[%c23, %c0_47], %143 {strides = array<i32>} : memref<64x128xf32, #tpu.memory_space<vmem>>, vector<1x128xf32>,
    %c24_i32 = arith.constant 24 : i32
    %145 = arith.addi %0, %c24_i32 : i32
    %146 = arith.index_cast %145 : i32 to index
    %147 = memref.load %arg1[%146] : memref<192xi32, #tpu.memory_space<smem>>
    %148 = arith.index_cast %147 : i32 to index
    %c0_48 = arith.constant 0 : index
    %149 = vector.load %arg2[%148, %c0_48] : memref<64x128xf32, #tpu.memory_space<vmem>>, vector<1x128xf32>
    %c24 = arith.constant 24 : index
    %c0_49 = arith.constant 0 : index
    %150 = vector.load %arg3[%c24, %c0_49] : memref<64x128xf32, #tpu.memory_space<vmem>>, vector<1x128xf32>
    tpu.vector_store %arg3[%c24, %c0_49], %149 {strides = array<i32>} : memref<64x128xf32, #tpu.memory_space<vmem>>, vector<1x128xf32>,
    %c25_i32 = arith.constant 25 : i32
    %151 = arith.addi %0, %c25_i32 : i32
    %152 = arith.index_cast %151 : i32 to index
    %153 = memref.load %arg1[%152] : memref<192xi32, #tpu.memory_space<smem>>
    %154 = arith.index_cast %153 : i32 to index
    %c0_50 = arith.constant 0 : index
    %155 = vector.load %arg2[%154, %c0_50] : memref<64x128xf32, #tpu.memory_space<vmem>>, vector<1x128xf32>
    %c25 = arith.constant 25 : index
    %c0_51 = arith.constant 0 : index
    %156 = vector.load %arg3[%c25, %c0_51] : memref<64x128xf32, #tpu.memory_space<vmem>>, vector<1x128xf32>
    tpu.vector_store %arg3[%c25, %c0_51], %155 {strides = array<i32>} : memref<64x128xf32, #tpu.memory_space<vmem>>, vector<1x128xf32>,
    %c26_i32 = arith.constant 26 : i32
    %157 = arith.addi %0, %c26_i32 : i32
    %158 = arith.index_cast %157 : i32 to index
    %159 = memref.load %arg1[%158] : memref<192xi32, #tpu.memory_space<smem>>
    %160 = arith.index_cast %159 : i32 to index
    %c0_52 = arith.constant 0 : index
    %161 = vector.load %arg2[%160, %c0_52] : memref<64x128xf32, #tpu.memory_space<vmem>>, vector<1x128xf32>
    %c26 = arith.constant 26 : index
    %c0_53 = arith.constant 0 : index
    %162 = vector.load %arg3[%c26, %c0_53] : memref<64x128xf32, #tpu.memory_space<vmem>>, vector<1x128xf32>
    tpu.vector_store %arg3[%c26, %c0_53], %161 {strides = array<i32>} : memref<64x128xf32, #tpu.memory_space<vmem>>, vector<1x128xf32>,
    %c27_i32 = arith.constant 27 : i32
    %163 = arith.addi %0, %c27_i32 : i32
    %164 = arith.index_cast %163 : i32 to index
    %165 = memref.load %arg1[%164] : memref<192xi32, #tpu.memory_space<smem>>
    %166 = arith.index_cast %165 : i32 to index
    %c0_54 = arith.constant 0 : index
    %167 = vector.load %arg2[%166, %c0_54] : memref<64x128xf32, #tpu.memory_space<vmem>>, vector<1x128xf32>
    %c27 = arith.constant 27 : index
    %c0_55 = arith.constant 0 : index
    %168 = vector.load %arg3[%c27, %c0_55] : memref<64x128xf32, #tpu.memory_space<vmem>>, vector<1x128xf32>
    tpu.vector_store %arg3[%c27, %c0_55], %167 {strides = array<i32>} : memref<64x128xf32, #tpu.memory_space<vmem>>, vector<1x128xf32>,
    %c28_i32 = arith.constant 28 : i32
    %169 = arith.addi %0, %c28_i32 : i32
    %170 = arith.index_cast %169 : i32 to index
    %171 = memref.load %arg1[%170] : memref<192xi32, #tpu.memory_space<smem>>
    %172 = arith.index_cast %171 : i32 to index
    %c0_56 = arith.constant 0 : index
    %173 = vector.load %arg2[%172, %c0_56] : memref<64x128xf32, #tpu.memory_space<vmem>>, vector<1x128xf32>
    %c28 = arith.constant 28 : index
    %c0_57 = arith.constant 0 : index
    %174 = vector.load %arg3[%c28, %c0_57] : memref<64x128xf32, #tpu.memory_space<vmem>>, vector<1x128xf32>
    tpu.vector_store %arg3[%c28, %c0_57], %173 {strides = array<i32>} : memref<64x128xf32, #tpu.memory_space<vmem>>, vector<1x128xf32>,
    %c29_i32 = arith.constant 29 : i32
    %175 = arith.addi %0, %c29_i32 : i32
    %176 = arith.index_cast %175 : i32 to index
    %177 = memref.load %arg1[%176] : memref<192xi32, #tpu.memory_space<smem>>
    %178 = arith.index_cast %177 : i32 to index
    %c0_58 = arith.constant 0 : index
    %179 = vector.load %arg2[%178, %c0_58] : memref<64x128xf32, #tpu.memory_space<vmem>>, vector<1x128xf32>
    %c29 = arith.constant 29 : index
    %c0_59 = arith.constant 0 : index
    %180 = vector.load %arg3[%c29, %c0_59] : memref<64x128xf32, #tpu.memory_space<vmem>>, vector<1x128xf32>
    tpu.vector_store %arg3[%c29, %c0_59], %179 {strides = array<i32>} : memref<64x128xf32, #tpu.memory_space<vmem>>, vector<1x128xf32>,
    %c30_i32 = arith.constant 30 : i32
    %181 = arith.addi %0, %c30_i32 : i32
    %182 = arith.index_cast %181 : i32 to index
    %183 = memref.load %arg1[%182] : memref<192xi32, #tpu.memory_space<smem>>
    %184 = arith.index_cast %183 : i32 to index
    %c0_60 = arith.constant 0 : index
    %185 = vector.load %arg2[%184, %c0_60] : memref<64x128xf32, #tpu.memory_space<vmem>>, vector<1x128xf32>
    %c30 = arith.constant 30 : index
    %c0_61 = arith.constant 0 : index
    %186 = vector.load %arg3[%c30, %c0_61] : memref<64x128xf32, #tpu.memory_space<vmem>>, vector<1x128xf32>
    tpu.vector_store %arg3[%c30, %c0_61], %185 {strides = array<i32>} : memref<64x128xf32, #tpu.memory_space<vmem>>, vector<1x128xf32>,
    %c31_i32 = arith.constant 31 : i32
    %187 = arith.addi %0, %c31_i32 : i32
    %188 = arith.index_cast %187 : i32 to index
    %189 = memref.load %arg1[%188] : memref<192xi32, #tpu.memory_space<smem>>
    %190 = arith.index_cast %189 : i32 to index
    %c0_62 = arith.constant 0 : index
    %191 = vector.load %arg2[%190, %c0_62] : memref<64x128xf32, #tpu.memory_space<vmem>>, vector<1x128xf32>
    %c31 = arith.constant 31 : index
    %c0_63 = arith.constant 0 : index
    %192 = vector.load %arg3[%c31, %c0_63] : memref<64x128xf32, #tpu.memory_space<vmem>>, vector<1x128xf32>
    tpu.vector_store %arg3[%c31, %c0_63], %191 {strides = array<i32>} : memref<64x128xf32, #tpu.memory_space<vmem>>, vector<1x128xf32>,
    %c32_i32 = arith.constant 32 : i32
    %193 = arith.addi %0, %c32_i32 : i32
    %194 = arith.index_cast %193 : i32 to index
    %195 = memref.load %arg1[%194] : memref<192xi32, #tpu.memory_space<smem>>
    %196 = arith.index_cast %195 : i32 to index
    %c0_64 = arith.constant 0 : index
    %197 = vector.load %arg2[%196, %c0_64] : memref<64x128xf32, #tpu.memory_space<vmem>>, vector<1x128xf32>
    %c32 = arith.constant 32 : index
    %c0_65 = arith.constant 0 : index
    %198 = vector.load %arg3[%c32, %c0_65] : memref<64x128xf32, #tpu.memory_space<vmem>>, vector<1x128xf32>
    tpu.vector_store %arg3[%c32, %c0_65], %197 {strides = array<i32>} : memref<64x128xf32, #tpu.memory_space<vmem>>, vector<1x128xf32>,
    %c33_i32 = arith.constant 33 : i32
    %199 = arith.addi %0, %c33_i32 : i32
    %200 = arith.index_cast %199 : i32 to index
    %201 = memref.load %arg1[%200] : memref<192xi32, #tpu.memory_space<smem>>
    %202 = arith.index_cast %201 : i32 to index
    %c0_66 = arith.constant 0 : index
    %203 = vector.load %arg2[%202, %c0_66] : memref<64x128xf32, #tpu.memory_space<vmem>>, vector<1x128xf32>
    %c33 = arith.constant 33 : index
    %c0_67 = arith.constant 0 : index
    %204 = vector.load %arg3[%c33, %c0_67] : memref<64x128xf32, #tpu.memory_space<vmem>>, vector<1x128xf32>
    tpu.vector_store %arg3[%c33, %c0_67], %203 {strides = array<i32>} : memref<64x128xf32, #tpu.memory_space<vmem>>, vector<1x128xf32>,
    %c34_i32 = arith.constant 34 : i32
    %205 = arith.addi %0, %c34_i32 : i32
    %206 = arith.index_cast %205 : i32 to index
    %207 = memref.load %arg1[%206] : memref<192xi32, #tpu.memory_space<smem>>
    %208 = arith.index_cast %207 : i32 to index
    %c0_68 = arith.constant 0 : index
    %209 = vector.load %arg2[%208, %c0_68] : memref<64x128xf32, #tpu.memory_space<vmem>>, vector<1x128xf32>
    %c34 = arith.constant 34 : index
    %c0_69 = arith.constant 0 : index
    %210 = vector.load %arg3[%c34, %c0_69] : memref<64x128xf32, #tpu.memory_space<vmem>>, vector<1x128xf32>
    tpu.vector_store %arg3[%c34, %c0_69], %209 {strides = array<i32>} : memref<64x128xf32, #tpu.memory_space<vmem>>, vector<1x128xf32>,
    %c35_i32 = arith.constant 35 : i32
    %211 = arith.addi %0, %c35_i32 : i32
    %212 = arith.index_cast %211 : i32 to index
    %213 = memref.load %arg1[%212] : memref<192xi32, #tpu.memory_space<smem>>
    %214 = arith.index_cast %213 : i32 to index
    %c0_70 = arith.constant 0 : index
    %215 = vector.load %arg2[%214, %c0_70] : memref<64x128xf32, #tpu.memory_space<vmem>>, vector<1x128xf32>
    %c35 = arith.constant 35 : index
    %c0_71 = arith.constant 0 : index
    %216 = vector.load %arg3[%c35, %c0_71] : memref<64x128xf32, #tpu.memory_space<vmem>>, vector<1x128xf32>
    tpu.vector_store %arg3[%c35, %c0_71], %215 {strides = array<i32>} : memref<64x128xf32, #tpu.memory_space<vmem>>, vector<1x128xf32>,
    %c36_i32 = arith.constant 36 : i32
    %217 = arith.addi %0, %c36_i32 : i32
    %218 = arith.index_cast %217 : i32 to index
    %219 = memref.load %arg1[%218] : memref<192xi32, #tpu.memory_space<smem>>
    %220 = arith.index_cast %219 : i32 to index
    %c0_72 = arith.constant 0 : index
    %221 = vector.load %arg2[%220, %c0_72] : memref<64x128xf32, #tpu.memory_space<vmem>>, vector<1x128xf32>
    %c36 = arith.constant 36 : index
    %c0_73 = arith.constant 0 : index
    %222 = vector.load %arg3[%c36, %c0_73] : memref<64x128xf32, #tpu.memory_space<vmem>>, vector<1x128xf32>
    tpu.vector_store %arg3[%c36, %c0_73], %221 {strides = array<i32>} : memref<64x128xf32, #tpu.memory_space<vmem>>, vector<1x128xf32>,
    %c37_i32 = arith.constant 37 : i32
    %223 = arith.addi %0, %c37_i32 : i32
    %224 = arith.index_cast %223 : i32 to index
    %225 = memref.load %arg1[%224] : memref<192xi32, #tpu.memory_space<smem>>
    %226 = arith.index_cast %225 : i32 to index
    %c0_74 = arith.constant 0 : index
    %227 = vector.load %arg2[%226, %c0_74] : memref<64x128xf32, #tpu.memory_space<vmem>>, vector<1x128xf32>
    %c37 = arith.constant 37 : index
    %c0_75 = arith.constant 0 : index
    %228 = vector.load %arg3[%c37, %c0_75] : memref<64x128xf32, #tpu.memory_space<vmem>>, vector<1x128xf32>
    tpu.vector_store %arg3[%c37, %c0_75], %227 {strides = array<i32>} : memref<64x128xf32, #tpu.memory_space<vmem>>, vector<1x128xf32>,
    %c38_i32 = arith.constant 38 : i32
    %229 = arith.addi %0, %c38_i32 : i32
    %230 = arith.index_cast %229 : i32 to index
    %231 = memref.load %arg1[%230] : memref<192xi32, #tpu.memory_space<smem>>
    %232 = arith.index_cast %231 : i32 to index
    %c0_76 = arith.constant 0 : index
    %233 = vector.load %arg2[%232, %c0_76] : memref<64x128xf32, #tpu.memory_space<vmem>>, vector<1x128xf32>
    %c38 = arith.constant 38 : index
    %c0_77 = arith.constant 0 : index
    %234 = vector.load %arg3[%c38, %c0_77] : memref<64x128xf32, #tpu.memory_space<vmem>>, vector<1x128xf32>
    tpu.vector_store %arg3[%c38, %c0_77], %233 {strides = array<i32>} : memref<64x128xf32, #tpu.memory_space<vmem>>, vector<1x128xf32>,
    %c39_i32 = arith.constant 39 : i32
    %235 = arith.addi %0, %c39_i32 : i32
    %236 = arith.index_cast %235 : i32 to index
    %237 = memref.load %arg1[%236] : memref<192xi32, #tpu.memory_space<smem>>
    %238 = arith.index_cast %237 : i32 to index
    %c0_78 = arith.constant 0 : index
    %239 = vector.load %arg2[%238, %c0_78] : memref<64x128xf32, #tpu.memory_space<vmem>>, vector<1x128xf32>
    %c39 = arith.constant 39 : index
    %c0_79 = arith.constant 0 : index
    %240 = vector.load %arg3[%c39, %c0_79] : memref<64x128xf32, #tpu.memory_space<vmem>>, vector<1x128xf32>
    tpu.vector_store %arg3[%c39, %c0_79], %239 {strides = array<i32>} : memref<64x128xf32, #tpu.memory_space<vmem>>, vector<1x128xf32>,
    %c40_i32 = arith.constant 40 : i32
    %241 = arith.addi %0, %c40_i32 : i32
    %242 = arith.index_cast %241 : i32 to index
    %243 = memref.load %arg1[%242] : memref<192xi32, #tpu.memory_space<smem>>
    %244 = arith.index_cast %243 : i32 to index
    %c0_80 = arith.constant 0 : index
    %245 = vector.load %arg2[%244, %c0_80] : memref<64x128xf32, #tpu.memory_space<vmem>>, vector<1x128xf32>
    %c40 = arith.constant 40 : index
    %c0_81 = arith.constant 0 : index
    %246 = vector.load %arg3[%c40, %c0_81] : memref<64x128xf32, #tpu.memory_space<vmem>>, vector<1x128xf32>
    tpu.vector_store %arg3[%c40, %c0_81], %245 {strides = array<i32>} : memref<64x128xf32, #tpu.memory_space<vmem>>, vector<1x128xf32>,
    %c41_i32 = arith.constant 41 : i32
    %247 = arith.addi %0, %c41_i32 : i32
    %248 = arith.index_cast %247 : i32 to index
    %249 = memref.load %arg1[%248] : memref<192xi32, #tpu.memory_space<smem>>
    %250 = arith.index_cast %249 : i32 to index
    %c0_82 = arith.constant 0 : index
    %251 = vector.load %arg2[%250, %c0_82] : memref<64x128xf32, #tpu.memory_space<vmem>>, vector<1x128xf32>
    %c41 = arith.constant 41 : index
    %c0_83 = arith.constant 0 : index
    %252 = vector.load %arg3[%c41, %c0_83] : memref<64x128xf32, #tpu.memory_space<vmem>>, vector<1x128xf32>
    tpu.vector_store %arg3[%c41, %c0_83], %251 {strides = array<i32>} : memref<64x128xf32, #tpu.memory_space<vmem>>, vector<1x128xf32>,
    %c42_i32 = arith.constant 42 : i32
    %253 = arith.addi %0, %c42_i32 : i32
    %254 = arith.index_cast %253 : i32 to index
    %255 = memref.load %arg1[%254] : memref<192xi32, #tpu.memory_space<smem>>
    %256 = arith.index_cast %255 : i32 to index
    %c0_84 = arith.constant 0 : index
    %257 = vector.load %arg2[%256, %c0_84] : memref<64x128xf32, #tpu.memory_space<vmem>>, vector<1x128xf32>
    %c42 = arith.constant 42 : index
    %c0_85 = arith.constant 0 : index
    %258 = vector.load %arg3[%c42, %c0_85] : memref<64x128xf32, #tpu.memory_space<vmem>>, vector<1x128xf32>
    tpu.vector_store %arg3[%c42, %c0_85], %257 {strides = array<i32>} : memref<64x128xf32, #tpu.memory_space<vmem>>, vector<1x128xf32>,
    %c43_i32 = arith.constant 43 : i32
    %259 = arith.addi %0, %c43_i32 : i32
    %260 = arith.index_cast %259 : i32 to index
    %261 = memref.load %arg1[%260] : memref<192xi32, #tpu.memory_space<smem>>
    %262 = arith.index_cast %261 : i32 to index
    %c0_86 = arith.constant 0 : index
    %263 = vector.load %arg2[%262, %c0_86] : memref<64x128xf32, #tpu.memory_space<vmem>>, vector<1x128xf32>
    %c43 = arith.constant 43 : index
    %c0_87 = arith.constant 0 : index
    %264 = vector.load %arg3[%c43, %c0_87] : memref<64x128xf32, #tpu.memory_space<vmem>>, vector<1x128xf32>
    tpu.vector_store %arg3[%c43, %c0_87], %263 {strides = array<i32>} : memref<64x128xf32, #tpu.memory_space<vmem>>, vector<1x128xf32>,
    %c44_i32 = arith.constant 44 : i32
    %265 = arith.addi %0, %c44_i32 : i32
    %266 = arith.index_cast %265 : i32 to index
    %267 = memref.load %arg1[%266] : memref<192xi32, #tpu.memory_space<smem>>
    %268 = arith.index_cast %267 : i32 to index
    %c0_88 = arith.constant 0 : index
    %269 = vector.load %arg2[%268, %c0_88] : memref<64x128xf32, #tpu.memory_space<vmem>>, vector<1x128xf32>
    %c44 = arith.constant 44 : index
    %c0_89 = arith.constant 0 : index
    %270 = vector.load %arg3[%c44, %c0_89] : memref<64x128xf32, #tpu.memory_space<vmem>>, vector<1x128xf32>
    tpu.vector_store %arg3[%c44, %c0_89], %269 {strides = array<i32>} : memref<64x128xf32, #tpu.memory_space<vmem>>, vector<1x128xf32>,
    %c45_i32 = arith.constant 45 : i32
    %271 = arith.addi %0, %c45_i32 : i32
    %272 = arith.index_cast %271 : i32 to index
    %273 = memref.load %arg1[%272] : memref<192xi32, #tpu.memory_space<smem>>
    %274 = arith.index_cast %273 : i32 to index
    %c0_90 = arith.constant 0 : index
    %275 = vector.load %arg2[%274, %c0_90] : memref<64x128xf32, #tpu.memory_space<vmem>>, vector<1x128xf32>
    %c45 = arith.constant 45 : index
    %c0_91 = arith.constant 0 : index
    %276 = vector.load %arg3[%c45, %c0_91] : memref<64x128xf32, #tpu.memory_space<vmem>>, vector<1x128xf32>
    tpu.vector_store %arg3[%c45, %c0_91], %275 {strides = array<i32>} : memref<64x128xf32, #tpu.memory_space<vmem>>, vector<1x128xf32>,
    %c46_i32 = arith.constant 46 : i32
    %277 = arith.addi %0, %c46_i32 : i32
    %278 = arith.index_cast %277 : i32 to index
    %279 = memref.load %arg1[%278] : memref<192xi32, #tpu.memory_space<smem>>
    %280 = arith.index_cast %279 : i32 to index
    %c0_92 = arith.constant 0 : index
    %281 = vector.load %arg2[%280, %c0_92] : memref<64x128xf32, #tpu.memory_space<vmem>>, vector<1x128xf32>
    %c46 = arith.constant 46 : index
    %c0_93 = arith.constant 0 : index
    %282 = vector.load %arg3[%c46, %c0_93] : memref<64x128xf32, #tpu.memory_space<vmem>>, vector<1x128xf32>
    tpu.vector_store %arg3[%c46, %c0_93], %281 {strides = array<i32>} : memref<64x128xf32, #tpu.memory_space<vmem>>, vector<1x128xf32>,
    %c47_i32 = arith.constant 47 : i32
    %283 = arith.addi %0, %c47_i32 : i32
    %284 = arith.index_cast %283 : i32 to index
    %285 = memref.load %arg1[%284] : memref<192xi32, #tpu.memory_space<smem>>
    %286 = arith.index_cast %285 : i32 to index
    %c0_94 = arith.constant 0 : index
    %287 = vector.load %arg2[%286, %c0_94] : memref<64x128xf32, #tpu.memory_space<vmem>>, vector<1x128xf32>
    %c47 = arith.constant 47 : index
    %c0_95 = arith.constant 0 : index
    %288 = vector.load %arg3[%c47, %c0_95] : memref<64x128xf32, #tpu.memory_space<vmem>>, vector<1x128xf32>
    tpu.vector_store %arg3[%c47, %c0_95], %287 {strides = array<i32>} : memref<64x128xf32, #tpu.memory_space<vmem>>, vector<1x128xf32>,
    %c48_i32 = arith.constant 48 : i32
    %289 = arith.addi %0, %c48_i32 : i32
    %290 = arith.index_cast %289 : i32 to index
    %291 = memref.load %arg1[%290] : memref<192xi32, #tpu.memory_space<smem>>
    %292 = arith.index_cast %291 : i32 to index
    %c0_96 = arith.constant 0 : index
    %293 = vector.load %arg2[%292, %c0_96] : memref<64x128xf32, #tpu.memory_space<vmem>>, vector<1x128xf32>
    %c48 = arith.constant 48 : index
    %c0_97 = arith.constant 0 : index
    %294 = vector.load %arg3[%c48, %c0_97] : memref<64x128xf32, #tpu.memory_space<vmem>>, vector<1x128xf32>
    tpu.vector_store %arg3[%c48, %c0_97], %293 {strides = array<i32>} : memref<64x128xf32, #tpu.memory_space<vmem>>, vector<1x128xf32>,
    %c49_i32 = arith.constant 49 : i32
    %295 = arith.addi %0, %c49_i32 : i32
    %296 = arith.index_cast %295 : i32 to index
    %297 = memref.load %arg1[%296] : memref<192xi32, #tpu.memory_space<smem>>
    %298 = arith.index_cast %297 : i32 to index
    %c0_98 = arith.constant 0 : index
    %299 = vector.load %arg2[%298, %c0_98] : memref<64x128xf32, #tpu.memory_space<vmem>>, vector<1x128xf32>
    %c49 = arith.constant 49 : index
    %c0_99 = arith.constant 0 : index
    %300 = vector.load %arg3[%c49, %c0_99] : memref<64x128xf32, #tpu.memory_space<vmem>>, vector<1x128xf32>
    tpu.vector_store %arg3[%c49, %c0_99], %299 {strides = array<i32>} : memref<64x128xf32, #tpu.memory_space<vmem>>, vector<1x128xf32>,
    %c50_i32 = arith.constant 50 : i32
    %301 = arith.addi %0, %c50_i32 : i32
    %302 = arith.index_cast %301 : i32 to index
    %303 = memref.load %arg1[%302] : memref<192xi32, #tpu.memory_space<smem>>
    %304 = arith.index_cast %303 : i32 to index
    %c0_100 = arith.constant 0 : index
    %305 = vector.load %arg2[%304, %c0_100] : memref<64x128xf32, #tpu.memory_space<vmem>>, vector<1x128xf32>
    %c50 = arith.constant 50 : index
    %c0_101 = arith.constant 0 : index
    %306 = vector.load %arg3[%c50, %c0_101] : memref<64x128xf32, #tpu.memory_space<vmem>>, vector<1x128xf32>
    tpu.vector_store %arg3[%c50, %c0_101], %305 {strides = array<i32>} : memref<64x128xf32, #tpu.memory_space<vmem>>, vector<1x128xf32>,
    %c51_i32 = arith.constant 51 : i32
    %307 = arith.addi %0, %c51_i32 : i32
    %308 = arith.index_cast %307 : i32 to index
    %309 = memref.load %arg1[%308] : memref<192xi32, #tpu.memory_space<smem>>
    %310 = arith.index_cast %309 : i32 to index
    %c0_102 = arith.constant 0 : index
    %311 = vector.load %arg2[%310, %c0_102] : memref<64x128xf32, #tpu.memory_space<vmem>>, vector<1x128xf32>
    %c51 = arith.constant 51 : index
    %c0_103 = arith.constant 0 : index
    %312 = vector.load %arg3[%c51, %c0_103] : memref<64x128xf32, #tpu.memory_space<vmem>>, vector<1x128xf32>
    tpu.vector_store %arg3[%c51, %c0_103], %311 {strides = array<i32>} : memref<64x128xf32, #tpu.memory_space<vmem>>, vector<1x128xf32>,
    %c52_i32 = arith.constant 52 : i32
    %313 = arith.addi %0, %c52_i32 : i32
    %314 = arith.index_cast %313 : i32 to index
    %315 = memref.load %arg1[%314] : memref<192xi32, #tpu.memory_space<smem>>
    %316 = arith.index_cast %315 : i32 to index
    %c0_104 = arith.constant 0 : index
    %317 = vector.load %arg2[%316, %c0_104] : memref<64x128xf32, #tpu.memory_space<vmem>>, vector<1x128xf32>
    %c52 = arith.constant 52 : index
    %c0_105 = arith.constant 0 : index
    %318 = vector.load %arg3[%c52, %c0_105] : memref<64x128xf32, #tpu.memory_space<vmem>>, vector<1x128xf32>
    tpu.vector_store %arg3[%c52, %c0_105], %317 {strides = array<i32>} : memref<64x128xf32, #tpu.memory_space<vmem>>, vector<1x128xf32>,
    %c53_i32 = arith.constant 53 : i32
    %319 = arith.addi %0, %c53_i32 : i32
    %320 = arith.index_cast %319 : i32 to index
    %321 = memref.load %arg1[%320] : memref<192xi32, #tpu.memory_space<smem>>
    %322 = arith.index_cast %321 : i32 to index
    %c0_106 = arith.constant 0 : index
    %323 = vector.load %arg2[%322, %c0_106] : memref<64x128xf32, #tpu.memory_space<vmem>>, vector<1x128xf32>
    %c53 = arith.constant 53 : index
    %c0_107 = arith.constant 0 : index
    %324 = vector.load %arg3[%c53, %c0_107] : memref<64x128xf32, #tpu.memory_space<vmem>>, vector<1x128xf32>
    tpu.vector_store %arg3[%c53, %c0_107], %323 {strides = array<i32>} : memref<64x128xf32, #tpu.memory_space<vmem>>, vector<1x128xf32>,
    %c54_i32 = arith.constant 54 : i32
    %325 = arith.addi %0, %c54_i32 : i32
    %326 = arith.index_cast %325 : i32 to index
    %327 = memref.load %arg1[%326] : memref<192xi32, #tpu.memory_space<smem>>
    %328 = arith.index_cast %327 : i32 to index
    %c0_108 = arith.constant 0 : index
    %329 = vector.load %arg2[%328, %c0_108] : memref<64x128xf32, #tpu.memory_space<vmem>>, vector<1x128xf32>
    %c54 = arith.constant 54 : index
    %c0_109 = arith.constant 0 : index
    %330 = vector.load %arg3[%c54, %c0_109] : memref<64x128xf32, #tpu.memory_space<vmem>>, vector<1x128xf32>
    tpu.vector_store %arg3[%c54, %c0_109], %329 {strides = array<i32>} : memref<64x128xf32, #tpu.memory_space<vmem>>, vector<1x128xf32>,
    %c55_i32 = arith.constant 55 : i32
    %331 = arith.addi %0, %c55_i32 : i32
    %332 = arith.index_cast %331 : i32 to index
    %333 = memref.load %arg1[%332] : memref<192xi32, #tpu.memory_space<smem>>
    %334 = arith.index_cast %333 : i32 to index
    %c0_110 = arith.constant 0 : index
    %335 = vector.load %arg2[%334, %c0_110] : memref<64x128xf32, #tpu.memory_space<vmem>>, vector<1x128xf32>
    %c55 = arith.constant 55 : index
    %c0_111 = arith.constant 0 : index
    %336 = vector.load %arg3[%c55, %c0_111] : memref<64x128xf32, #tpu.memory_space<vmem>>, vector<1x128xf32>
    tpu.vector_store %arg3[%c55, %c0_111], %335 {strides = array<i32>} : memref<64x128xf32, #tpu.memory_space<vmem>>, vector<1x128xf32>,
    %c56_i32 = arith.constant 56 : i32
    %337 = arith.addi %0, %c56_i32 : i32
    %338 = arith.index_cast %337 : i32 to index
    %339 = memref.load %arg1[%338] : memref<192xi32, #tpu.memory_space<smem>>
    %340 = arith.index_cast %339 : i32 to index
    %c0_112 = arith.constant 0 : index
    %341 = vector.load %arg2[%340, %c0_112] : memref<64x128xf32, #tpu.memory_space<vmem>>, vector<1x128xf32>
    %c56 = arith.constant 56 : index
    %c0_113 = arith.constant 0 : index
    %342 = vector.load %arg3[%c56, %c0_113] : memref<64x128xf32, #tpu.memory_space<vmem>>, vector<1x128xf32>
    tpu.vector_store %arg3[%c56, %c0_113], %341 {strides = array<i32>} : memref<64x128xf32, #tpu.memory_space<vmem>>, vector<1x128xf32>,
    %c57_i32 = arith.constant 57 : i32
    %343 = arith.addi %0, %c57_i32 : i32
    %344 = arith.index_cast %343 : i32 to index
    %345 = memref.load %arg1[%344] : memref<192xi32, #tpu.memory_space<smem>>
    %346 = arith.index_cast %345 : i32 to index
    %c0_114 = arith.constant 0 : index
    %347 = vector.load %arg2[%346, %c0_114] : memref<64x128xf32, #tpu.memory_space<vmem>>, vector<1x128xf32>
    %c57 = arith.constant 57 : index
    %c0_115 = arith.constant 0 : index
    %348 = vector.load %arg3[%c57, %c0_115] : memref<64x128xf32, #tpu.memory_space<vmem>>, vector<1x128xf32>
    tpu.vector_store %arg3[%c57, %c0_115], %347 {strides = array<i32>} : memref<64x128xf32, #tpu.memory_space<vmem>>, vector<1x128xf32>,
    %c58_i32 = arith.constant 58 : i32
    %349 = arith.addi %0, %c58_i32 : i32
    %350 = arith.index_cast %349 : i32 to index
    %351 = memref.load %arg1[%350] : memref<192xi32, #tpu.memory_space<smem>>
    %352 = arith.index_cast %351 : i32 to index
    %c0_116 = arith.constant 0 : index
    %353 = vector.load %arg2[%352, %c0_116] : memref<64x128xf32, #tpu.memory_space<vmem>>, vector<1x128xf32>
    %c58 = arith.constant 58 : index
    %c0_117 = arith.constant 0 : index
    %354 = vector.load %arg3[%c58, %c0_117] : memref<64x128xf32, #tpu.memory_space<vmem>>, vector<1x128xf32>
    tpu.vector_store %arg3[%c58, %c0_117], %353 {strides = array<i32>} : memref<64x128xf32, #tpu.memory_space<vmem>>, vector<1x128xf32>,
    %c59_i32 = arith.constant 59 : i32
    %355 = arith.addi %0, %c59_i32 : i32
    %356 = arith.index_cast %355 : i32 to index
    %357 = memref.load %arg1[%356] : memref<192xi32, #tpu.memory_space<smem>>
    %358 = arith.index_cast %357 : i32 to index
    %c0_118 = arith.constant 0 : index
    %359 = vector.load %arg2[%358, %c0_118] : memref<64x128xf32, #tpu.memory_space<vmem>>, vector<1x128xf32>
    %c59 = arith.constant 59 : index
    %c0_119 = arith.constant 0 : index
    %360 = vector.load %arg3[%c59, %c0_119] : memref<64x128xf32, #tpu.memory_space<vmem>>, vector<1x128xf32>
    tpu.vector_store %arg3[%c59, %c0_119], %359 {strides = array<i32>} : memref<64x128xf32, #tpu.memory_space<vmem>>, vector<1x128xf32>,
    %c60_i32 = arith.constant 60 : i32
    %361 = arith.addi %0, %c60_i32 : i32
    %362 = arith.index_cast %361 : i32 to index
    %363 = memref.load %arg1[%362] : memref<192xi32, #tpu.memory_space<smem>>
    %364 = arith.index_cast %363 : i32 to index
    %c0_120 = arith.constant 0 : index
    %365 = vector.load %arg2[%364, %c0_120] : memref<64x128xf32, #tpu.memory_space<vmem>>, vector<1x128xf32>
    %c60 = arith.constant 60 : index
    %c0_121 = arith.constant 0 : index
    %366 = vector.load %arg3[%c60, %c0_121] : memref<64x128xf32, #tpu.memory_space<vmem>>, vector<1x128xf32>
    tpu.vector_store %arg3[%c60, %c0_121], %365 {strides = array<i32>} : memref<64x128xf32, #tpu.memory_space<vmem>>, vector<1x128xf32>,
    %c61_i32 = arith.constant 61 : i32
    %367 = arith.addi %0, %c61_i32 : i32
    %368 = arith.index_cast %367 : i32 to index
    %369 = memref.load %arg1[%368] : memref<192xi32, #tpu.memory_space<smem>>
    %370 = arith.index_cast %369 : i32 to index
    %c0_122 = arith.constant 0 : index
    %371 = vector.load %arg2[%370, %c0_122] : memref<64x128xf32, #tpu.memory_space<vmem>>, vector<1x128xf32>
    %c61 = arith.constant 61 : index
    %c0_123 = arith.constant 0 : index
    %372 = vector.load %arg3[%c61, %c0_123] : memref<64x128xf32, #tpu.memory_space<vmem>>, vector<1x128xf32>
    tpu.vector_store %arg3[%c61, %c0_123], %371 {strides = array<i32>} : memref<64x128xf32, #tpu.memory_space<vmem>>, vector<1x128xf32>,
    %c62_i32 = arith.constant 62 : i32
    %373 = arith.addi %0, %c62_i32 : i32
    %374 = arith.index_cast %373 : i32 to index
    %375 = memref.load %arg1[%374] : memref<192xi32, #tpu.memory_space<smem>>
    %376 = arith.index_cast %375 : i32 to index
    %c0_124 = arith.constant 0 : index
    %377 = vector.load %arg2[%376, %c0_124] : memref<64x128xf32, #tpu.memory_space<vmem>>, vector<1x128xf32>
    %c62 = arith.constant 62 : index
    %c0_125 = arith.constant 0 : index
    %378 = vector.load %arg3[%c62, %c0_125] : memref<64x128xf32, #tpu.memory_space<vmem>>, vector<1x128xf32>
    tpu.vector_store %arg3[%c62, %c0_125], %377 {strides = array<i32>} : memref<64x128xf32, #tpu.memory_space<vmem>>, vector<1x128xf32>,
    %c63_i32 = arith.constant 63 : i32
    %379 = arith.addi %0, %c63_i32 : i32
    %380 = arith.index_cast %379 : i32 to index
    %381 = memref.load %arg1[%380] : memref<192xi32, #tpu.memory_space<smem>>
    %382 = arith.index_cast %381 : i32 to index
    %c0_126 = arith.constant 0 : index
    %383 = vector.load %arg2[%382, %c0_126] : memref<64x128xf32, #tpu.memory_space<vmem>>, vector<1x128xf32>
    %c63 = arith.constant 63 : index
    %c0_127 = arith.constant 0 : index
    %384 = vector.load %arg3[%c63, %c0_127] : memref<64x128xf32, #tpu.memory_space<vmem>>, vector<1x128xf32>
    tpu.vector_store %arg3[%c63, %c0_127], %383 {strides = array<i32>} : memref<64x128xf32, #tpu.memory_space<vmem>>, vector<1x128xf32>,
    return
  }
  func.func @transform_0(%arg0: i32, %arg1: memref<192xi32, #tpu.memory_space<smem>>) -> (i32, i32) {
    %c0_i32 = arith.constant 0 : i32
    %c0_i32_0 = arith.constant 0 : i32
    %c0_i32_1 = arith.constant 0 : i32
    return %c0_i32, %c0_i32_0 : i32, i32
  }
  func.func @transform_1(%arg0: i32, %arg1: memref<192xi32, #tpu.memory_space<smem>>) -> (i32, i32) {
    %c0_i32 = arith.constant 0 : i32
    %c0_i32_0 = arith.constant 0 : i32
    return %arg0, %c0_i32 : i32, i32
  }
}

</mosaic_0001>

<bundles_post_ra>
// kernel: tpu_custom_call.1
= control target key start
LH: loop header
LB: loop body
LE: loop exit
PB: predicated region body
PF: predicated region fallthrough
CT: control target
= control target key end

     0   :  { %s1057_s0 = inlined_call_operand.hbm [shape: s32[192], index: 0, kind: input, shape index: {}]   ;;  %s1058_s1 = inlined_call_operand.hbm [shape: f32[64,128], index: 1, kind: input, shape index: {}]   ;;  %s1059_s2 = inlined_call_operand.hbm [shape: f32[192,128], index: 2, kind: output, shape index: {}]  }
   0x1   :  { %s644_s11 = scalar_lea.hbm %s1057_s0, 32 }
   0x2   :  { %p645_p0 = scmp.ne.s32.totalorder %s1057_s0, %s644_s11  ;;  %p648_p1 = scmp.lt.u32.totalorder %s644_s11, %s1057_s0 }
   0x4   :  { %p650_p2 = pnand %p648_p1, %p645_p0 }
   0x6   :  { %653 = shalt.err (!%p650_p2)  }
   0x7   :  { %s752_s16 = smov [#allocation3]  }
   0x8   :  { %8 = dma.hbm_to_smem %s1057_s0, 32, %s752_s16, [#allocation2] }
   0x9   :  { %726 = dma.done.wait [#allocation2], 32 }
   0xa   :  { %727 = vsyncadd [#allocation2], 4294967264 }
   0xb   :  { %10 = sfence }
   0xc   :  { %11 = vsyncpa [#allocation5], 0 }
   0xd   :  { %12 = vsyncpa [#allocation6], 0 }
   0xe   :  { %14 = vsyncpa [#allocation6 + $0x1], 0  ;;  %s786_s19 = smov 0   ;;  %s788_s20 = smov 0  }
   0xf   :  { %s790_s21 = smov 0   ;;  %s792_s22 = smov 0  }
  0x10 LB: > { %s807_s0 = sadd.s32 4294967295, %s750_s22   ;;  %s576_s23 = sadd.s32 4294967294, %s750_s22   ;;  %s750_s22 = sphi %s792_s22, %s1075_s22   ;;  %s746_s21 = sphi %s790_s21, %s1074_s21   ;;  %s742_s20 = sphi %s788_s20, %s1073_s20   ;;  %s738_s19 = sphi %s786_s19, %s1072_s19  }
  0x11   : > { %s811_s24 = sadd.s32 1, %s750_s22   ;;  %s48_s25 = sadd.s32 1, %s746_s21 }
  0x12   : > { %s45_s26 = ssub.s32 %s750_s22, %s811_s24  ;;  %p58_p3 = scmp.ne.s32.totalorder %s746_s21, %s742_s20 }
  0x13   : > { %p46_p4 = scmp.eq.s32.totalorder %s45_s26, 0  ;;  %p59_p5 = scmp.eq.s32.totalorder %s807_s0, 2 }
  0x14   : > { %p64_p6 = scmp.ne.s32.totalorder %s742_s20, %s738_s19  ;;  %p65_p7 = scmp.eq.s32.totalorder %s576_s23, 2 }
  0x15   : > { %s822_s27 = scalar_select %p46_p4, %s746_s21, %s48_s25  }
  0x16   : > { %p824_p8 = por %p59_p5, %p58_p3  ;;  %p828_p9 = por %p65_p7, %p64_p6 }
  0x17   : > { %p577_p10 = scmp.ge.s32.totalorder %s750_s22, 1  ;;  %p72_p11 = scmp.lt.s32.totalorder %s750_s22, 4 }
  0x18   : > { %s1063_s28 = scalar_select %p824_p8, 1, 0 }
  0x19   : > { %s1064_s29 = scalar_select %p828_p9, 1, 0 }
  0x1a   : > { %p1060_p12 = scmp.eq.s32.totalorder %s807_s0, 0  ;;  %p835_p13 = pnand %p577_p10, %p72_p11 }
  0x1b   : > { %s753_s3 = smov [#allocation4]   ;;  %s654_s8 = scalar_lea.hbm %s1058_s1, 1024 }
  0x1c   : > { %s1065_s30 = scalar_select %p835_p13, 1, 0 }
  0x1d   : > { %s84_s4 = sshll.u32 %s753_s3, 4  ;;  %p595_p0 = pneg %p835_p13  ;;  %s85_s4 = int_to_ptr.vmem [resolvable:$true] %s84_s4 }
  0x1e   : > { %p655_p2 = scmp.ne.s32.totalorder %s1058_s1, %s654_s8  ;;  %p661_p6 = scmp.lt.u32.totalorder %s654_s8, %s1058_s1 }
  0x1f   : > { %p843_p1 = pnand %p1060_p12, %p595_p0 }
  0x21   : > { %p656_p3 = pneg %p843_p1 }
  0x23   : > { %p657_p4 = pnand %p656_p3, %p655_p2 }
  0x25   : > { %p658_p5 = pneg %p657_p4 }
  0x27   : > { %p663_p7 = pnand %p661_p6, %p658_p5 }
  0x29   : > { %666 = shalt.err (!%p663_p7)
}
  0x2a   : > { %s667_s13 = scalar_lea.vmem %s85_s4, 1024  ;;  %p675_p12 = scmp.lt.s32.totalorder %s85_s4, %s85_s4 }
  0x2b   : > { %p668_p10 = scmp.ne.s32.totalorder %s85_s4, %s667_s13  ;;  %p676_p9 = scmp.lt.s32.totalorder %s667_s13, %s667_s13 }
  0x2d   : > { %p670_p11 = pnand %p668_p10, %p656_p3  ;;  %p677_p8 = por %p676_p9, %p675_p12 }
  0x2f   : > { %p671_p0 = pneg %p670_p11 }
  0x31   : > { %p678_p13 = pnand %p677_p8, %p671_p0 }
  0x33   : > { %681 = shalt.err (!%p678_p13)
}
  0x34   : > { %s754_s14 = smov 128   ;;  %s755_s15 = smov 8  }
  0x35   : > { %598 = dma.hbm_to_vmem [thread:$0]  (!%p843_p1), %s1058_s1, 1024, %s85_s4, [#allocation5], %s754_s14, %s754_s14, %s755_s15  }
  0x36   : > { %p1067_p2 = scmp.ne.s32.totalorder %s1065_s30, 0 }
  0x37   : > { %p1068_p4 = scmp.eq.s32.totalorder (!%p1067_p2), %s807_s0, 0 }
  0x38   : > { %100 = sbr.rel (%p1067_p2) target bundleno = 188 (0xbc), region = 24 }
  0x3f   : > { %729 = dma.done.wait (%p1068_p4), [#allocation5], 1024   ;;  %p1069_p3 = pmov %p1068_p4 }
  0x40   : > { %s112_s18 = sand.u32 1, %s742_s20   ;;  %s871_s23 = sshll.u32 %s807_s0, 6 }
  0x41   : > { %731 = vsyncadd (%p1069_p3), [#allocation5], 4294966272  ;;  %s581_s25 = sshll.u32 %s112_s18, 6  ;;  %s117_s26 = sld [smem:[#allocation3 + %s871_s23]] }
  0x42   : > { %s121_s30 = sadd.s32 1, %s871_s23  ;;  %s126_s3 = sadd.s32 2, %s871_s23 }
  0x43   : > { %s122_s4 = sld [smem:[#allocation3 + %s121_s30]]  ;;  %s131_s6 = sadd.s32 3, %s871_s23 }
  0x44   : > { %s127_s5 = sld [smem:[#allocation3 + %s126_s3]]  ;;  %s136_s7 = sadd.s32 4, %s871_s23 }
  0x45   : > { %s132_s8 = sld [smem:[#allocation3 + %s131_s6]]  ;;  %s141_s10 = sadd.s32 5, %s871_s23 }
  0x46   : > { %s137_s9 = sld [smem:[#allocation3 + %s136_s7]]  ;;  %s146_s13 = sadd.s32 6, %s871_s23 }
  0x47   : > { %s118_s11 = scalar_lea.vmem [#allocation4], %s117_s26  ;;  %s142_s12 = sld [smem:[#allocation3 + %s141_s10]] }
  0x48   : > { %v119_v0 = vld [vmem:[%s118_s11] sm:$0x1]  ;;  %s882_s14 = scalar_lea.vmem [#allocation7], %s581_s25  ;;  %s147_s15 = sld [smem:[#allocation3 + %s146_s13]] }
  0x49   : > { %120 = vst [vmem:[%s882_s14] sm:$0x1] %v119_v0  ;;  %s151_s16 = sadd.s32 7, %s871_s23  ;;  %s123_s17 = scalar_lea.vmem [#allocation4], %s122_s4 }
  0x4a   : > { %v124_v1 = vld [vmem:[%s123_s17] sm:$0x1]  ;;  %s128_s30 = scalar_lea.vmem [#allocation4], %s127_s5  ;;  %s152_s26 = sld [smem:[#allocation3 + %s151_s16]] }
  0x4b   : > { %v129_v2 = vld [vmem:[%s128_s30] sm:$0x1]  ;;  %s156_s3 = sadd.s32 8, %s871_s23  ;;  %125 = vst [vmem:[%s882_s14 + $0x1] sm:$0x1] %v124_v1  ;;  %s133_s25 = scalar_lea.vmem [#allocation4], %s132_s8 }
  0x4c   : > { %130 = vst [vmem:[%s882_s14 + $0x2] sm:$0x1] %v129_v2  ;;  %v134_v3 = vld [vmem:[%s133_s25] sm:$0x1]  ;;  %s138_s6 = scalar_lea.vmem [#allocation4], %s137_s9  ;;  %s157_s7 = sld [smem:[#allocation3 + %s156_s3]] }
  0x4d   : > { %v139_v4 = vld [vmem:[%s138_s6] sm:$0x1]  ;;  %s161_s10 = sadd.s32 9, %s871_s23  ;;  %135 = vst [vmem:[%s882_s14 + $0x3] sm:$0x1] %v134_v3  ;;  %s143_s5 = scalar_lea.vmem [#allocation4], %s142_s12 }
  0x4e   : > { %140 = vst [vmem:[%s882_s14 + $0x4] sm:$0x1] %v139_v4  ;;  %s162_s4 = sld [smem:[#allocation3 + %s161_s10]]  ;;  %v144_v5 = vld [vmem:[%s143_s5] sm:$0x1]  ;;  %s166_s11 = sadd.s32 10, %s871_s23 }
  0x4f   : > { %145 = vst [vmem:[%s882_s14 + $0x5] sm:$0x1] %v144_v5  ;;  %s148_s13 = scalar_lea.vmem [#allocation4], %s147_s15  ;;  %s167_s8 = sld [smem:[#allocation3 + %s166_s11]] }
  0x50   : > { %v149_v6 = vld [vmem:[%s148_s13] sm:$0x1]  ;;  %s171_s16 = sadd.s32 11, %s871_s23  ;;  %s153_s17 = scalar_lea.vmem [#allocation4], %s152_s26 }
  0x51   : > { %150 = vst [vmem:[%s882_s14 + $0x6] sm:$0x1] %v149_v6  ;;  %s172_s9 = sld [smem:[#allocation3 + %s171_s16]]  ;;  %v154_v7 = vld [vmem:[%s153_s17] sm:$0x1]  ;;  %s176_s30 = sadd.s32 12, %s871_s23 }
  0x52   : > { %s181_s3 = sadd.s32 13, %s871_s23  ;;  %155 = vst [vmem:[%s882_s14 + $0x7] sm:$0x1] %v154_v7  ;;  %s177_s12 = sld [smem:[#allocation3 + %s176_s30]] }
  0x53   : > { %s158_s25 = scalar_lea.vmem [#allocation4], %s157_s7  ;;  %s182_s15 = sld [smem:[#allocation3 + %s181_s3]] }
  0x54   : > { %v159_v8 = vld [vmem:[%s158_s25] sm:$0x1]  ;;  %s163_s6 = scalar_lea.vmem [#allocation4], %s162_s4  ;;  %s186_s10 = sadd.s32 14, %s871_s23 }
  0x55   : > { %160 = vst [vmem:[%s882_s14 + $0x8] sm:$0x1] %v159_v8  ;;  %v164_v9 = vld [vmem:[%s163_s6] sm:$0x1]  ;;  %s191_s5 = sadd.s32 15, %s871_s23  ;;  %s187_s26 = sld [smem:[#allocation3 + %s186_s10]] }
  0x56   : > { %165 = vst [vmem:[%s882_s14 + $0x9] sm:$0x1] %v164_v9  ;;  %s168_s11 = scalar_lea.vmem [#allocation4], %s167_s8  ;;  %s192_s13 = sld [smem:[#allocation3 + %s191_s5]] }
  0x57   : > { %v169_v10 = vld [vmem:[%s168_s11] sm:$0x1]  ;;  %s173_s7 = scalar_lea.vmem [#allocation4], %s172_s9  ;;  %s196_s16 = sadd.s32 16, %s871_s23 }
  0x58   : > { %170 = vst [vmem:[%s882_s14 + $0xa] sm:$0x1] %v169_v10  ;;  %v174_v11 = vld [vmem:[%s173_s7] sm:$0x1]  ;;  %s201_s17 = sadd.s32 17, %s871_s23  ;;  %s197_s4 = sld [smem:[#allocation3 + %s196_s16]] }
  0x59   : > { %175 = vst [vmem:[%s882_s14 + $0xb] sm:$0x1] %v174_v11  ;;  %s178_s30 = scalar_lea.vmem [#allocation4], %s177_s12  ;;  %s202_s3 = sld [smem:[#allocation3 + %s201_s17]] }
  0x5a   : > { %v179_v12 = vld [vmem:[%s178_s30] sm:$0x1]  ;;  %s183_s8 = scalar_lea.vmem [#allocation4], %s182_s15  ;;  %s206_s25 = sadd.s32 18, %s871_s23 }
  0x5b   : > { %180 = vst [vmem:[%s882_s14 + $0xc] sm:$0x1] %v179_v12  ;;  %v184_v13 = vld [vmem:[%s183_s8] sm:$0x1]  ;;  %s211_s6 = sadd.s32 19, %s871_s23  ;;  %s207_s9 = sld [smem:[#allocation3 + %s206_s25]] }
  0x5c   : > { %185 = vst [vmem:[%s882_s14 + $0xd] sm:$0x1] %v184_v13  ;;  %s188_s10 = scalar_lea.vmem [#allocation4], %s187_s26  ;;  %s212_s5 = sld [smem:[#allocation3 + %s211_s6]] }
  0x5d   : > { %v189_v14 = vld [vmem:[%s188_s10] sm:$0x1]  ;;  %s193_s12 = scalar_lea.vmem [#allocation4], %s192_s13  ;;  %s216_s11 = sadd.s32 20, %s871_s23 }
  0x5e   : > { %190 = vst [vmem:[%s882_s14 + $0xe] sm:$0x1] %v189_v14  ;;  %v194_v15 = vld [vmem:[%s193_s12] sm:$0x1]  ;;  %s221_s7 = sadd.s32 21, %s871_s23  ;;  %s217_s15 = sld [smem:[#allocation3 + %s216_s11]] }
  0x5f   : > { %195 = vst [vmem:[%s882_s14 + $0xf] sm:$0x1] %v194_v15  ;;  %s198_s16 = scalar_lea.vmem [#allocation4], %s197_s4  ;;  %s222_s17 = sld [smem:[#allocation3 + %s221_s7]] }
  0x60   : > { %v199_v16 = vld [vmem:[%s198_s16] sm:$0x1]  ;;  %s203_s26 = scalar_lea.vmem [#allocation4], %s202_s3  ;;  %s226_s30 = sadd.s32 22, %s871_s23 }
  0x61   : > { %200 = vst [vmem:[%s882_s14 + $0x10] sm:$0x1] %v199_v16  ;;  %v204_v17 = vld [vmem:[%s203_s26] sm:$0x1]  ;;  %s231_s8 = sadd.s32 23, %s871_s23  ;;  %s227_s13 = sld [smem:[#allocation3 + %s226_s30]] }
  0x62   : > { %205 = vst [vmem:[%s882_s14 + $0x11] sm:$0x1] %v204_v17  ;;  %s208_s25 = scalar_lea.vmem [#allocation4], %s207_s9  ;;  %s232_s6 = sld [smem:[#allocation3 + %s231_s8]] }
  0x63   : > { %v209_v18 = vld [vmem:[%s208_s25] sm:$0x1]  ;;  %s213_s4 = scalar_lea.vmem [#allocation4], %s212_s5  ;;  %s236_s10 = sadd.s32 24, %s871_s23 }
  0x64   : > { %210 = vst [vmem:[%s882_s14 + $0x12] sm:$0x1] %v209_v18  ;;  %v214_v19 = vld [vmem:[%s213_s4] sm:$0x1]  ;;  %s241_s12 = sadd.s32 25, %s871_s23  ;;  %s237_s3 = sld [smem:[#allocation3 + %s236_s10]] }
  0x65   : > { %215 = vst [vmem:[%s882_s14 + $0x13] sm:$0x1] %v214_v19  ;;  %s218_s11 = scalar_lea.vmem [#allocation4], %s217_s15  ;;  %s242_s7 = sld [smem:[#allocation3 + %s241_s12]] }
  0x66   : > { %v219_v20 = vld [vmem:[%s218_s11] sm:$0x1]  ;;  %s223_s9 = scalar_lea.vmem [#allocation4], %s222_s17  ;;  %s246_s16 = sadd.s32 26, %s871_s23 }
  0x67   : > { %220 = vst [vmem:[%s882_s14 + $0x14] sm:$0x1] %v219_v20  ;;  %v224_v21 = vld [vmem:[%s223_s9] sm:$0x1]  ;;  %s251_s26 = sadd.s32 27, %s871_s23  ;;  %s247_s5 = sld [smem:[#allocation3 + %s246_s16]] }
  0x68   : > { %225 = vst [vmem:[%s882_s14 + $0x15] sm:$0x1] %v224_v21  ;;  %s228_s30 = scalar_lea.vmem [#allocation4], %s227_s13  ;;  %s252_s8 = sld [smem:[#allocation3 + %s251_s26]] }
  0x69   : > { %v229_v22 = vld [vmem:[%s228_s30] sm:$0x1]  ;;  %s233_s15 = scalar_lea.vmem [#allocation4], %s232_s6  ;;  %s256_s25 = sadd.s32 28, %s871_s23 }
  0x6a   : > { %230 = vst [vmem:[%s882_s14 + $0x16] sm:$0x1] %v229_v22  ;;  %v234_v23 = vld [vmem:[%s233_s15] sm:$0x1]  ;;  %s261_s4 = sadd.s32 29, %s871_s23  ;;  %s257_s17 = sld [smem:[#allocation3 + %s256_s25]] }
  0x6b   : > { %235 = vst [vmem:[%s882_s14 + $0x17] sm:$0x1] %v234_v23  ;;  %s238_s10 = scalar_lea.vmem [#allocation4], %s237_s3  ;;  %s262_s12 = sld [smem:[#allocation3 + %s261_s4]] }
  0x6c   : > { %v239_v24 = vld [vmem:[%s238_s10] sm:$0x1]  ;;  %s243_s13 = scalar_lea.vmem [#allocation4], %s242_s7  ;;  %s266_s11 = sadd.s32 30, %s871_s23 }
  0x6d   : > { %240 = vst [vmem:[%s882_s14 + $0x18] sm:$0x1] %v239_v24  ;;  %v244_v25 = vld [vmem:[%s243_s13] sm:$0x1]  ;;  %s271_s9 = sadd.s32 31, %s871_s23  ;;  %s267_s6 = sld [smem:[#allocation3 + %s266_s11]] }
  0x6e   : > { %245 = vst [vmem:[%s882_s14 + $0x19] sm:$0x1] %v244_v25  ;;  %s248_s16 = scalar_lea.vmem [#allocation4], %s247_s5  ;;  %s272_s26 = sld [smem:[#allocation3 + %s271_s9]] }
  0x6f   : > { %v249_v26 = vld [vmem:[%s248_s16] sm:$0x1]  ;;  %s253_s3 = scalar_lea.vmem [#allocation4], %s252_s8  ;;  %s276_s30 = sadd.s32 32, %s871_s23 }
  0x70   : > { %250 = vst [vmem:[%s882_s14 + $0x1a] sm:$0x1] %v249_v26  ;;  %v254_v27 = vld [vmem:[%s253_s3] sm:$0x1]  ;;  %s281_s15 = sadd.s32 33, %s871_s23  ;;  %s277_s7 = sld [smem:[#allocation3 + %s276_s30]] }
  0x71   : > { %255 = vst [vmem:[%s882_s14 + $0x1b] sm:$0x1] %v254_v27  ;;  %s258_s25 = scalar_lea.vmem [#allocation4], %s257_s17  ;;  %s282_s4 = sld [smem:[#allocation3 + %s281_s15]] }
  0x72   : > { %v259_v28 = vld [vmem:[%s258_s25] sm:$0x1]  ;;  %s263_s5 = scalar_lea.vmem [#allocation4], %s262_s12  ;;  %s286_s10 = sadd.s32 34, %s871_s23 }
  0x73   : > { %260 = vst [vmem:[%s882_s14 + $0x1c] sm:$0x1] %v259_v28  ;;  %v264_v29 = vld [vmem:[%s263_s5] sm:$0x1]  ;;  %s291_s13 = sadd.s32 35, %s871_s23  ;;  %s287_s8 = sld [smem:[#allocation3 + %s286_s10]] }
  0x74   : > { %265 = vst [vmem:[%s882_s14 + $0x1d] sm:$0x1] %v264_v29  ;;  %s268_s11 = scalar_lea.vmem [#allocation4], %s267_s6  ;;  %s292_s9 = sld [smem:[#allocation3 + %s291_s13]] }
  0x75   : > { %v269_v30 = vld [vmem:[%s268_s11] sm:$0x1]  ;;  %s273_s17 = scalar_lea.vmem [#allocation4], %s272_s26  ;;  %s296_s16 = sadd.s32 36, %s871_s23 }
  0x76   : > { %270 = vst [vmem:[%s882_s14 + $0x1e] sm:$0x1] %v269_v30  ;;  %v274_v31 = vld [vmem:[%s273_s17] sm:$0x1]  ;;  %s301_s3 = sadd.s32 37, %s871_s23  ;;  %s297_s12 = sld [smem:[#allocation3 + %s296_s16]] }
  0x77   : > { %275 = vst [vmem:[%s882_s14 + $0x1f] sm:$0x1] %v274_v31  ;;  %s278_s30 = scalar_lea.vmem [#allocation4], %s277_s7  ;;  %s302_s15 = sld [smem:[#allocation3 + %s301_s3]] }
  0x78   : > { %v279_v32 = vld [vmem:[%s278_s30] sm:$0x1]  ;;  %s283_s6 = scalar_lea.vmem [#allocation4], %s282_s4  ;;  %s306_s25 = sadd.s32 38, %s871_s23 }
  0x79   : > { %280 = vst [vmem:[%s882_s14 + $0x20] sm:$0x1] %v279_v32  ;;  %v284_v33 = vld [vmem:[%s283_s6] sm:$0x1]  ;;  %s311_s5 = sadd.s32 39, %s871_s23  ;;  %s307_s26 = sld [smem:[#allocation3 + %s306_s25]] }
  0x7a   : > { %285 = vst [vmem:[%s882_s14 + $0x21] sm:$0x1] %v284_v33  ;;  %s288_s10 = scalar_lea.vmem [#allocation4], %s287_s8  ;;  %s312_s13 = sld [smem:[#allocation3 + %s311_s5]] }
  0x7b   : > { %v289_v34 = vld [vmem:[%s288_s10] sm:$0x1]  ;;  %s293_s7 = scalar_lea.vmem [#allocation4], %s292_s9  ;;  %s316_s11 = sadd.s32 40, %s871_s23 }
  0x7c   : > { %290 = vst [vmem:[%s882_s14 + $0x22] sm:$0x1] %v289_v34  ;;  %v294_v35 = vld [vmem:[%s293_s7] sm:$0x1]  ;;  %s321_s17 = sadd.s32 41, %s871_s23  ;;  %s317_s4 = sld [smem:[#allocation3 + %s316_s11]] }
  0x7d   : > { %295 = vst [vmem:[%s882_s14 + $0x23] sm:$0x1] %v294_v35  ;;  %s298_s16 = scalar_lea.vmem [#allocation4], %s297_s12  ;;  %s322_s3 = sld [smem:[#allocation3 + %s321_s17]] }
  0x7e   : > { %v299_v36 = vld [vmem:[%s298_s16] sm:$0x1]  ;;  %s303_s8 = scalar_lea.vmem [#allocation4], %s302_s15  ;;  %s326_s30 = sadd.s32 42, %s871_s23 }
  0x7f   : > { %300 = vst [vmem:[%s882_s14 + $0x24] sm:$0x1] %v299_v36  ;;  %v304_v37 = vld [vmem:[%s303_s8] sm:$0x1]  ;;  %s331_s6 = sadd.s32 43, %s871_s23  ;;  %s327_s9 = sld [smem:[#allocation3 + %s326_s30]] }
  0x80   : > { %305 = vst [vmem:[%s882_s14 + $0x25] sm:$0x1] %v304_v37  ;;  %s308_s25 = scalar_lea.vmem [#allocation4], %s307_s26  ;;  %s332_s5 = sld [smem:[#allocation3 + %s331_s6]] }
  0x81   : > { %v309_v38 = vld [vmem:[%s308_s25] sm:$0x1]  ;;  %s313_s12 = scalar_lea.vmem [#allocation4], %s312_s13  ;;  %s336_s10 = sadd.s32 44, %s871_s23 }
  0x82   : > { %310 = vst [vmem:[%s882_s14 + $0x26] sm:$0x1] %v309_v38  ;;  %v314_v39 = vld [vmem:[%s313_s12] sm:$0x1]  ;;  %s341_s7 = sadd.s32 45, %s871_s23  ;;  %s337_s15 = sld [smem:[#allocation3 + %s336_s10]] }
  0x83   : > { %315 = vst [vmem:[%s882_s14 + $0x27] sm:$0x1] %v314_v39  ;;  %s318_s11 = scalar_lea.vmem [#allocation4], %s317_s4  ;;  %s342_s17 = sld [smem:[#allocation3 + %s341_s7]] }
  0x84   : > { %v319_v40 = vld [vmem:[%s318_s11] sm:$0x1]  ;;  %s323_s26 = scalar_lea.vmem [#allocation4], %s322_s3  ;;  %s346_s16 = sadd.s32 46, %s871_s23 }
  0x85   : > { %320 = vst [vmem:[%s882_s14 + $0x28] sm:$0x1] %v319_v40  ;;  %v324_v41 = vld [vmem:[%s323_s26] sm:$0x1]  ;;  %s351_s8 = sadd.s32 47, %s871_s23  ;;  %s347_s13 = sld [smem:[#allocation3 + %s346_s16]] }
  0x86   : > { %325 = vst [vmem:[%s882_s14 + $0x29] sm:$0x1] %v324_v41  ;;  %s328_s30 = scalar_lea.vmem [#allocation4], %s327_s9  ;;  %s352_s6 = sld [smem:[#allocation3 + %s351_s8]] }
  0x87   : > { %v329_v42 = vld [vmem:[%s328_s30] sm:$0x1]  ;;  %s333_s4 = scalar_lea.vmem [#allocation4], %s332_s5  ;;  %s356_s25 = sadd.s32 48, %s871_s23 }
  0x88   : > { %330 = vst [vmem:[%s882_s14 + $0x2a] sm:$0x1] %v329_v42  ;;  %v334_v43 = vld [vmem:[%s333_s4] sm:$0x1]  ;;  %s361_s12 = sadd.s32 49, %s871_s23  ;;  %s357_s3 = sld [smem:[#allocation3 + %s356_s25]] }
  0x89   : > { %335 = vst [vmem:[%s882_s14 + $0x2b] sm:$0x1] %v334_v43  ;;  %s338_s10 = scalar_lea.vmem [#allocation4], %s337_s15  ;;  %s362_s7 = sld [smem:[#allocation3 + %s361_s12]] }
  0x8a   : > { %v339_v44 = vld [vmem:[%s338_s10] sm:$0x1]  ;;  %s343_s9 = scalar_lea.vmem [#allocation4], %s342_s17  ;;  %s366_s11 = sadd.s32 50, %s871_s23 }
  0x8b   : > { %340 = vst [vmem:[%s882_s14 + $0x2c] sm:$0x1] %v339_v44  ;;  %v344_v45 = vld [vmem:[%s343_s9] sm:$0x1]  ;;  %s371_s26 = sadd.s32 51, %s871_s23  ;;  %s367_s5 = sld [smem:[#allocation3 + %s366_s11]] }
  0x8c   : > { %345 = vst [vmem:[%s882_s14 + $0x2d] sm:$0x1] %v344_v45  ;;  %s348_s16 = scalar_lea.vmem [#allocation4], %s347_s13  ;;  %s372_s8 = sld [smem:[#allocation3 + %s371_s26]] }
  0x8d   : > { %v349_v46 = vld [vmem:[%s348_s16] sm:$0x1]  ;;  %s353_s15 = scalar_lea.vmem [#allocation4], %s352_s6  ;;  %s376_s30 = sadd.s32 52, %s871_s23 }
  0x8e   : > { %350 = vst [vmem:[%s882_s14 + $0x2e] sm:$0x1] %v349_v46  ;;  %v354_v47 = vld [vmem:[%s353_s15] sm:$0x1]  ;;  %s381_s4 = sadd.s32 53, %s871_s23  ;;  %s377_s17 = sld [smem:[#allocation3 + %s376_s30]] }
  0x8f   : > { %355 = vst [vmem:[%s882_s14 + $0x2f] sm:$0x1] %v354_v47  ;;  %s358_s25 = scalar_lea.vmem [#allocation4], %s357_s3  ;;  %s382_s12 = sld [smem:[#allocation3 + %s381_s4]] }
  0x90   : > { %v359_v48 = vld [vmem:[%s358_s25] sm:$0x1]  ;;  %s363_s13 = scalar_lea.vmem [#allocation4], %s362_s7  ;;  %s386_s10 = sadd.s32 54, %s871_s23 }
  0x91   : > { %360 = vst [vmem:[%s882_s14 + $0x30] sm:$0x1] %v359_v48  ;;  %v364_v49 = vld [vmem:[%s363_s13] sm:$0x1]  ;;  %s391_s9 = sadd.s32 55, %s871_s23  ;;  %s387_s6 = sld [smem:[#allocation3 + %s386_s10]] }
  0x92   : > { %365 = vst [vmem:[%s882_s14 + $0x31] sm:$0x1] %v364_v49  ;;  %s368_s11 = scalar_lea.vmem [#allocation4], %s367_s5  ;;  %s392_s26 = sld [smem:[#allocation3 + %s391_s9]] }
  0x93   : > { %v369_v50 = vld [vmem:[%s368_s11] sm:$0x1]  ;;  %s373_s3 = scalar_lea.vmem [#allocation4], %s372_s8  ;;  %s396_s16 = sadd.s32 56, %s871_s23 }
  0x94   : > { %370 = vst [vmem:[%s882_s14 + $0x32] sm:$0x1] %v369_v50  ;;  %v374_v51 = vld [vmem:[%s373_s3] sm:$0x1]  ;;  %s401_s15 = sadd.s32 57, %s871_s23  ;;  %s397_s7 = sld [smem:[#allocation3 + %s396_s16]] }
  0x95   : > { %375 = vst [vmem:[%s882_s14 + $0x33] sm:$0x1] %v374_v51  ;;  %s378_s30 = scalar_lea.vmem [#allocation4], %s377_s17  ;;  %s402_s4 = sld [smem:[#allocation3 + %s401_s15]] }
  0x96   : > { %v379_v52 = vld [vmem:[%s378_s30] sm:$0x1]  ;;  %s383_s5 = scalar_lea.vmem [#allocation4], %s382_s12  ;;  %s406_s25 = sadd.s32 58, %s871_s23 }
  0x97   : > { %380 = vst [vmem:[%s882_s14 + $0x34] sm:$0x1] %v379_v52  ;;  %v384_v53 = vld [vmem:[%s383_s5] sm:$0x1]  ;;  %s411_s13 = sadd.s32 59, %s871_s23  ;;  %s407_s8 = sld [smem:[#allocation3 + %s406_s25]] }
  0x98   : > { %385 = vst [vmem:[%s882_s14 + $0x35] sm:$0x1] %v384_v53  ;;  %s388_s10 = scalar_lea.vmem [#allocation4], %s387_s6  ;;  %s412_s9 = sld [smem:[#allocation3 + %s411_s13]] }
  0x99   : > { %v389_v54 = vld [vmem:[%s388_s10] sm:$0x1]  ;;  %s393_s17 = scalar_lea.vmem [#allocation4], %s392_s26  ;;  %s416_s11 = sadd.s32 60, %s871_s23 }
  0x9a   : > { %390 = vst [vmem:[%s882_s14 + $0x36] sm:$0x1] %v389_v54  ;;  %v394_v55 = vld [vmem:[%s393_s17] sm:$0x1]  ;;  %s421_s3 = sadd.s32 61, %s871_s23  ;;  %s417_s12 = sld [smem:[#allocation3 + %s416_s11]] }
  0x9b   : > { %395 = vst [vmem:[%s882_s14 + $0x37] sm:$0x1] %v394_v55  ;;  %s398_s16 = scalar_lea.vmem [#allocation4], %s397_s7  ;;  %s422_s15 = sld [smem:[#allocation3 + %s421_s3]] }
  0x9c   : > { %v399_v56 = vld [vmem:[%s398_s16] sm:$0x1]  ;;  %s403_s6 = scalar_lea.vmem [#allocation4], %s402_s4  ;;  %s426_s30 = sadd.s32 62, %s871_s23 }
  0x9d   : > { %400 = vst [vmem:[%s882_s14 + $0x38] sm:$0x1] %v399_v56  ;;  %v404_v57 = vld [vmem:[%s403_s6] sm:$0x1]  ;;  %s431_s5 = sadd.s32 63, %s871_s23  ;;  %s427_s26 = sld [smem:[#allocation3 + %s426_s30]] }
  0x9e   : > { %405 = vst [vmem:[%s882_s14 + $0x39] sm:$0x1] %v404_v57  ;;  %s408_s25 = scalar_lea.vmem [#allocation4], %s407_s8  ;;  %s432_s13 = sld [smem:[#allocation3 + %s431_s5]] }
  0x9f   : > { %v409_v58 = vld [vmem:[%s408_s25] sm:$0x1]  ;;  %s413_s7 = scalar_lea.vmem [#allocation4], %s412_s9  ;;  %s588_s10 = sshll.u32 %s807_s0, 10 }
  0xa0   : > { %410 = vst [vmem:[%s882_s14 + $0x3a] sm:$0x1] %v409_v58  ;;  %v414_v59 = vld [vmem:[%s413_s7] sm:$0x1]  ;;  %s450_s17 = sshll.u32 %s882_s14, 4  ;;  %s418_s4 = scalar_lea.vmem [#allocation4], %s417_s12  ;;  %s1009_s17 = int_to_ptr.vmem [resolvable:$true] %s450_s17 }
  0xa1   : > { %415 = vst [vmem:[%s882_s14 + $0x3b] sm:$0x1] %v414_v59  ;;  %v419_v60 = vld [vmem:[%s418_s4] sm:$0x1]  ;;  %s423_s23 = scalar_lea.vmem [#allocation4], %s422_s15  ;;  %s1007_s3 = scalar_lea.hbm %s1059_s2, %s588_s10 }
  0xa2   : > { %420 = vst [vmem:[%s882_s14 + $0x3c] sm:$0x1] %v419_v60  ;;  %v424_v61 = vld [vmem:[%s423_s23] sm:$0x1]  ;;  %s1016_s12 = scalar_lea.sflag [#allocation6], %s112_s18  ;;  %s682_s16 = scalar_lea.vmem %s1009_s17, 1024 }
  0xa3   : > { %425 = vst [vmem:[%s882_s14 + $0x3d] sm:$0x1] %v424_v61  ;;  %s428_s0 = scalar_lea.vmem [#allocation4], %s427_s26  ;;  %p683_p8 = scmp.ne.s32.totalorder %s1009_s17, %s682_s16 }
  0xa4   : > { %v429_v62 = vld [vmem:[%s428_s0] sm:$0x1]  ;;  %s433_s9 = scalar_lea.vmem [#allocation4], %s432_s13  ;;  %p1070_p9 = scmp.ne.s32.totalorder %s1063_s28, 0 }
  0xa5   : > { %430 = vst [vmem:[%s882_s14 + $0x3e] sm:$0x1] %v429_v62  ;;  %v434_v63 = vld [vmem:[%s433_s9] sm:$0x1]  ;;  %s756_s15 = smov [#allocation7]  }
  0xa6   : > { %435 = vst [vmem:[%s882_s14 + $0x3f] sm:$0x1] %v434_v63  ;;  %p684_p12 = pnand %p683_p8, %p1070_p9  ;;  %s686_s6 = sshll.u32 %s756_s15, 4  ;;  %s687_s6 = int_to_ptr.vmem [resolvable:$false] %s686_s6 }
  0xa7   : > { %s688_s30 = scalar_lea.vmem %s687_s6, 2048  ;;  %p689_p1 = scmp.lt.s32.totalorder %s1009_s17, %s687_s6 }
  0xa8   : > { %p685_p13 = pneg %p684_p12  ;;  %p690_p5 = scmp.lt.s32.totalorder %s688_s30, %s682_s16 }
  0xaa   : > { %p691_p6 = por %p690_p5, %p689_p1 }
  0xac   : > { %p692_p7 = pnand %p691_p6, %p685_p13 }
  0xae   : > { %695 = shalt.err (!%p692_p7)
}
  0xaf   : > { %s696_s18 = scalar_lea.hbm %s1007_s3, 1024  ;;  %s700_s26 = scalar_lea.hbm %s1059_s2, 3072 }
  0xb0   : > { %p697_p10 = scmp.ne.s32.totalorder %s1007_s3, %s696_s18  ;;  %p701_p2 = scmp.lt.u32.totalorder %s1007_s3, %s1059_s2 }
  0xb1   : > { %p702_p4 = scmp.lt.u32.totalorder %s700_s26, %s696_s18  ;;  %p704_p8 = scmp.lt.u32.totalorder %s696_s18, %s1007_s3 }
  0xb2   : > { %p698_p11 = pnand %p697_p10, %p1070_p9 }
  0xb3   : > { %p703_p3 = por %p702_p4, %p701_p2 }
  0xb4   : > { %p699_p0 = pneg %p698_p11 }
  0xb5   : > { %p705_p12 = por %p704_p8, %p703_p3 }
  0xb7   : > { %p706_p13 = pnand %p705_p12, %p699_p0 }
  0xb9   : > { %709 = shalt.err (!%p706_p13)
}
  0xba   : > { %s757_s7 = smov 128   ;;  %s758_s10 = smov 8  }
  0xbb   : > { %593 = dma.vmem_to_hbm [thread:$0]  (%p1070_p9), %s1009_s17, 1024, %s1007_s3, %s1016_s12, %s757_s7, %s757_s7, %s758_s10  }
  0xbc PF: > { %p605_p1 = scmp.ge.s32.totalorder %s750_s22, 2  ;;  %s465_s4 = sand.u32 1, %s738_s19  }
  0xbd   : > { %p1071_p5 = scmp.ne.s32.totalorder %s1064_s29, 0  ;;  %s466_s23 = scalar_lea.sflag [#allocation6], %s465_s4 }
  0xbf   : > { %p600_p6 = pnand %p605_p1, %p1071_p5 }
  0xc1   : > { %733 = dma.done.wait (!%p600_p6), %s466_s23, 1024  }
  0xc2   : > { %735 = vsyncadd (!%p600_p6), %s466_s23, 4294966272  ;;  %p17_p7 = scmp.ge.s32.totalorder %s811_s24, 5   ;;  %s1072_s19 = smov %s742_s20 }
  0xc3   : > { %s1073_s20 = smov %s746_s21  ;;  %s1074_s21 = smov %s822_s27 }
  0xc4   : > { %s1075_s22 = smov %s811_s24  ;;  %19 = sbr.rel (!%p17_p7) target bundleno = 16 (0x10), region = 125 }
  0xcb   :  { %471 = vsyncpa [#allocation5], 1 }
  0xcc   :  { %473 = vsyncpa [#allocation5 + $0x1], 1 }
  0xcd   :  { %474 = vsyncpa [#allocation6], 1 }
  0xce   :  { %476 = vsyncpa [#allocation6 + $0x1], 1 }

</bundles_post_ra>
